<compile_context>
chip_gen: v5e
topology: v5e:2x2
jax: 0.10.0
libtpu: 0.0.40
codegen_flags: <defaults>
</compile_context>

<pallas_src>
import numpy as np
import jax
import jax.numpy as jnp
from jax.experimental import pallas as pl
from jax.experimental.pallas import tpu as pltpu

# ------------------------- configuration (small shapes) -------------------------
B, T = 2, 16
IN_CH, OUT_CH = 1, 1
INNLAY, MIDLAY = 2, 2            # fixed inside NN_custom.__init__
N_A = [2, 2]
N_B = [3, 3]
N_K = [1, 0]                     # G1 has n_k=1, G2 has n_k=0
N_HIDDEN = [32]
H = N_HIDDEN[0]

P1 = INNLAY * IN_CH              # (out, in) filter pairs of G1  (= 2)
P2 = OUT_CH * MIDLAY             # (out, in) filter pairs of G2  (= 2)


# ----------------------------------- kernel -------------------------------------
def nn_custom_kernel(u_ref, hc1_ref, hc2_ref, w1a_ref, w1b_ref, bh1_ref,
                     w2a_ref, w2b_ref, bh2a_ref, bh2b_ref, y_ref):
    u = u_ref[...]                                   # (T, B): time on sublanes, batch on lanes

    def shifted(sig, k):
        # causal shift by k samples along time (zero initial conditions)
        if k == 0:
            return sig
        return jnp.concatenate(
            [jnp.zeros((k, sig.shape[1]), jnp.float32), sig[:T - k, :]], axis=0)

    # ---- G1: two SISO IIR filters applied as length-T impulse-response FIRs ----
    hc1 = hc1_ref[...]                               # (P1*T, B): rows o*T+k = tap k of pair o
    y1_0 = hc1[0:1, :] * u
    y1_1 = hc1[T:T + 1, :] * u
    for k in range(1, T):                            # independent taps: no serial AR chain
        s = shifted(u, k)
        y1_0 = y1_0 + hc1[k:k + 1, :] * s
        y1_1 = y1_1 + hc1[T + k:T + k + 1, :] * s

    # ---- F1: static MLP fused across the batch (block-diagonal weights, f32 MXU) ----
    h = jnp.tanh(jnp.dot(y1_0, w1a_ref[...], preferred_element_type=jnp.float32)
                 + jnp.dot(y1_1, w1b_ref[...], preferred_element_type=jnp.float32)
                 + bh1_ref[...])                     # (T, B*H)
    z0 = jnp.dot(h, w2a_ref[...], preferred_element_type=jnp.float32) + bh2a_ref[...]
    z1 = jnp.dot(h, w2b_ref[...], preferred_element_type=jnp.float32) + bh2b_ref[...]

    # ---- G2: two SISO filters summed straight onto the output lanes (no sum-matrix dot)
    hc2 = hc2_ref[...]                               # (P2*T, B)
    acc = hc2[0:1, :] * z0 + hc2[T:T + 1, :] * z1
    for k in range(1, T):
        acc = (acc + hc2[k:k + 1, :] * shifted(z0, k)
                   + hc2[T + k:T + k + 1, :] * shifted(z1, k))

    y_ref[...] = acc.astype(y_ref.dtype)             # (T, B)


# ----------------------- one-time parameter preparation --------------------------
def prepare_params(b1, a1, b2, a2, w1, bh1, w2, bh2):
    """Host-side, called once: impulse responses + block-diag MLP weights (kernel-ready)."""
    b1 = np.asarray(b1, np.float64); a1 = np.asarray(a1, np.float64)
    b2 = np.asarray(b2, np.float64); a2 = np.asarray(a2, np.float64)
    w1 = np.asarray(w1, np.float64); bh1 = np.asarray(bh1, np.float64)
    w2 = np.asarray(w2, np.float64); bh2 = np.asarray(bh2, np.float64)

    b1e = np.concatenate([np.zeros((INNLAY, IN_CH, N_K[0])), b1], axis=-1)   # n_k=1 pad
    b2e = b2                                                                 # n_k=0

    def impulse(b, a, n):
        h = np.zeros(n)
        for t in range(n):
            acc = b[t] if t < len(b) else 0.0
            for j in range(len(a)):
                if t - 1 - j >= 0:
                    acc -= a[j] * h[t - 1 - j]
            h[t] = acc
        return h

    hc1 = np.zeros((P1 * T, B), np.float32)
    for o in range(INNLAY):
        hc1[o * T:(o + 1) * T, :] = impulse(b1e[o, 0], a1[o, 0], T)[:, None]
    hc2 = np.zeros((P2 * T, B), np.float32)
    for i in range(MIDLAY):
        hc2[i * T:(i + 1) * T, :] = impulse(b2e[0, i], a2[0, i], T)[:, None]

    eye = np.eye(B)
    prep = dict(
        hc1=hc1, hc2=hc2,
        w1a=np.kron(eye, w1[0:1, :]).astype(np.float32),        # (B,   B*H)
        w1b=np.kron(eye, w1[1:2, :]).astype(np.float32),        # (B,   B*H)
        bh1=np.tile(bh1.reshape(1, H), (1, B)).astype(np.float32),  # (1, B*H)
        w2a=np.kron(eye, w2[:, 0:1]).astype(np.float32),        # (B*H, B)
        w2b=np.kron(eye, w2[:, 1:2]).astype(np.float32),        # (B*H, B)
        bh2a=np.full((1, B), bh2[0, 0], np.float32),
        bh2b=np.full((1, B), bh2[0, 1], np.float32),
    )
    return {k: jnp.asarray(v) for k, v in prep.items()}


# ------------------------------- jitted forward ----------------------------------
@jax.jit
def nn_custom_forward(x, prep):
    # single tiny layout op per call: (B, T, IN_CH) -> (T, B)
    u = jnp.transpose(x, (1, 0, 2)).reshape(T, B)

    vmem = pl.BlockSpec(memory_space=pltpu.MemorySpace.VMEM)    # whole array, no grid
    y = pl.pallas_call(
        nn_custom_kernel,
        out_shape=jax.ShapeDtypeStruct((T, B), jnp.float32),
        in_specs=[vmem] * 10,
        out_specs=vmem,
    )(u, prep["hc1"], prep["hc2"], prep["w1a"], prep["w1b"], prep["bh1"],
      prep["w2a"], prep["w2b"], prep["bh2a"], prep["bh2b"])

    return jnp.transpose(y).reshape(B, T, OUT_CH)


# ----------------------------- numpy reference model -----------------------------
def _lfilter_ref(b, a, u):
    y = np.zeros_like(u, dtype=np.float64)
    for t in range(u.shape[0]):
        acc = 0.0
        for k in range(len(b)):
            if t - k >= 0:
                acc += b[k] * u[t - k]
        for j in range(len(a)):
            if t - 1 - j >= 0:
                acc -= a[j] * y[t - 1 - j]
        y[t] = acc
    return y


def _mimo_ref(b, a, u):
    Bn, Tn, Cin = u.shape
    Cout = b.shape[0]
    y = np.zeros((Bn, Tn, Cout), dtype=np.float64)
    for bb in range(Bn):
        for o in range(Cout):
            for i in range(Cin):
                y[bb, :, o] += _lfilter_ref(b[o, i], a[o, i], u[bb, :, i])
    return y


def ref_forward(x, b1e, a1, b2e, a2, w1, bh1, w2, bh2):
    y1 = _mimo_ref(np.asarray(b1e, np.float64), np.asarray(a1, np.float64),
                   np.asarray(x, np.float64))
    h = np.tanh(y1 @ np.asarray(w1, np.float64) + np.asarray(bh1, np.float64))
    z = h @ np.asarray(w2, np.float64) + np.asarray(bh2, np.float64)
    y2 = _mimo_ref(np.asarray(b2e, np.float64), np.asarray(a2, np.float64), z)
    return y2


# ------------------------------------- main --------------------------------------
if __name__ == "__main__":
    key = jax.random.PRNGKey(0)
    ks = jax.random.split(key, 10)
    scale = 0.01  # dynoNet-style small init for LTI coefficients (keeps filters stable)

    # G1 parameters: b (INNLAY, IN_CH, n_b), a (INNLAY, IN_CH, n_a); n_k=1
    b1 = jax.random.uniform(ks[0], (INNLAY, IN_CH, N_B[0]), jnp.float32, -scale, scale)
    a1 = jax.random.uniform(ks[1], (INNLAY, IN_CH, N_A[0]), jnp.float32, -scale, scale)
    b1_eff = jnp.concatenate([jnp.zeros((INNLAY, IN_CH, N_K[0]), jnp.float32), b1], axis=-1)

    # G2 parameters: b (OUT_CH, MIDLAY, n_b), a (OUT_CH, MIDLAY, n_a); n_k=0
    b2 = jax.random.uniform(ks[2], (OUT_CH, MIDLAY, N_B[1]), jnp.float32, -scale, scale)
    a2 = jax.random.uniform(ks[3], (OUT_CH, MIDLAY, N_A[1]), jnp.float32, -scale, scale)
    b2_eff = b2

    # F1 parameters (Linear(2,H) -> tanh -> Linear(H,2)), stored (in, out) for x @ W
    lim1 = 1.0 / np.sqrt(INNLAY)
    lim2 = 1.0 / np.sqrt(H)
    w1 = jax.random.uniform(ks[4], (INNLAY, H), jnp.float32, -lim1, lim1)
    bh1 = jax.random.uniform(ks[5], (1, H), jnp.float32, -lim1, lim1)
    w2 = jax.random.uniform(ks[6], (H, MIDLAY), jnp.float32, -lim2, lim2)
    bh2 = jax.random.uniform(ks[7], (1, MIDLAY), jnp.float32, -lim2, lim2)

    # input (B, T, IN_CH)
    x = jax.random.normal(ks[8], (B, T, IN_CH), jnp.float32)

    # one-time parameter preparation (cached outside the per-call path)
    prep = prepare_params(b1, a1, b2, a2, w1, bh1, w2, bh2)

    y = nn_custom_forward(x, prep)
    y = jax.block_until_ready(y)

    y_ref = ref_forward(np.asarray(x), b1_eff, a1, b2_eff, a2,
                        np.asarray(w1), np.asarray(bh1), np.asarray(w2), np.asarray(bh2))
    assert y.shape == (B, T, OUT_CH)
    assert np.allclose(np.asarray(y), y_ref, rtol=1e-3, atol=1e-4), (
        np.max(np.abs(np.asarray(y) - y_ref)))

    print("KERNEL_OK")
</pallas_src>

<mosaic_0001>
module attributes {stable_mosaic.version = 11 : i64} {
  func.func @nn_custom_kernel(%arg0: memref<16x2xf32, #tpu.memory_space<vmem>>, %arg1: memref<32x2xf32, #tpu.memory_space<vmem>>, %arg2: memref<32x2xf32, #tpu.memory_space<vmem>>, %arg3: memref<2x64xf32, #tpu.memory_space<vmem>>, %arg4: memref<2x64xf32, #tpu.memory_space<vmem>>, %arg5: memref<1x64xf32, #tpu.memory_space<vmem>>, %arg6: memref<64x2xf32, #tpu.memory_space<vmem>>, %arg7: memref<64x2xf32, #tpu.memory_space<vmem>>, %arg8: memref<1x2xf32, #tpu.memory_space<vmem>>, %arg9: memref<1x2xf32, #tpu.memory_space<vmem>>, %arg10: memref<16x2xf32, #tpu.memory_space<vmem>>) attributes {dimension_semantics = [], scalar_prefetch = 0 : i64, scratch_operands = 0 : i64, tpu.core_type = #tpu.core_type<tc>} {
    %c0 = arith.constant 0 : index
    %c0_0 = arith.constant 0 : index
    %0 = vector.load %arg0[%c0, %c0_0] : memref<16x2xf32, #tpu.memory_space<vmem>>, vector<16x2xf32>
    %c0_1 = arith.constant 0 : index
    %c0_2 = arith.constant 0 : index
    %1 = vector.load %arg1[%c0_1, %c0_2] : memref<32x2xf32, #tpu.memory_space<vmem>>, vector<32x2xf32>
    %2 = vector.extract_strided_slice %1 {offsets = [0, 0], sizes = [1, 2], strides = [1, 1]} : vector<32x2xf32> to vector<1x2xf32>
    %3 = vector.broadcast %2 : vector<1x2xf32> to vector<16x2xf32>
    %4 = arith.mulf %3, %0 : vector<16x2xf32>
    %5 = vector.extract_strided_slice %1 {offsets = [16, 0], sizes = [1, 2], strides = [1, 1]} : vector<32x2xf32> to vector<1x2xf32>
    %6 = vector.broadcast %5 : vector<1x2xf32> to vector<16x2xf32>
    %7 = arith.mulf %6, %0 : vector<16x2xf32>
    %cst = arith.constant 0.000000e+00 : f32
    %8 = vector.broadcast %cst : f32 to vector<1x2xf32>
    %9 = vector.extract_strided_slice %0 {offsets = [0, 0], sizes = [15, 2], strides = [1, 1]} : vector<16x2xf32> to vector<15x2xf32>
    %10 = tpu.concatenate %8, %9 in 0 : vector<1x2xf32>, vector<15x2xf32> -> vector<16x2xf32>
    %11 = vector.extract_strided_slice %1 {offsets = [1, 0], sizes = [1, 2], strides = [1, 1]} : vector<32x2xf32> to vector<1x2xf32>
    %12 = vector.broadcast %11 : vector<1x2xf32> to vector<16x2xf32>
    %13 = arith.mulf %12, %10 : vector<16x2xf32>
    %14 = arith.addf %4, %13 : vector<16x2xf32>
    %15 = vector.extract_strided_slice %1 {offsets = [17, 0], sizes = [1, 2], strides = [1, 1]} : vector<32x2xf32> to vector<1x2xf32>
    %16 = vector.broadcast %15 : vector<1x2xf32> to vector<16x2xf32>
    %17 = arith.mulf %16, %10 : vector<16x2xf32>
    %18 = arith.addf %7, %17 : vector<16x2xf32>
    %cst_3 = arith.constant 0.000000e+00 : f32
    %19 = vector.broadcast %cst_3 : f32 to vector<2x2xf32>
    %20 = vector.extract_strided_slice %0 {offsets = [0, 0], sizes = [14, 2], strides = [1, 1]} : vector<16x2xf32> to vector<14x2xf32>
    %21 = tpu.concatenate %19, %20 in 0 : vector<2x2xf32>, vector<14x2xf32> -> vector<16x2xf32>
    %22 = vector.extract_strided_slice %1 {offsets = [2, 0], sizes = [1, 2], strides = [1, 1]} : vector<32x2xf32> to vector<1x2xf32>
    %23 = vector.broadcast %22 : vector<1x2xf32> to vector<16x2xf32>
    %24 = arith.mulf %23, %21 : vector<16x2xf32>
    %25 = arith.addf %14, %24 : vector<16x2xf32>
    %26 = vector.extract_strided_slice %1 {offsets = [18, 0], sizes = [1, 2], strides = [1, 1]} : vector<32x2xf32> to vector<1x2xf32>
    %27 = vector.broadcast %26 : vector<1x2xf32> to vector<16x2xf32>
    %28 = arith.mulf %27, %21 : vector<16x2xf32>
    %29 = arith.addf %18, %28 : vector<16x2xf32>
    %cst_4 = arith.constant 0.000000e+00 : f32
    %30 = vector.broadcast %cst_4 : f32 to vector<3x2xf32>
    %31 = vector.extract_strided_slice %0 {offsets = [0, 0], sizes = [13, 2], strides = [1, 1]} : vector<16x2xf32> to vector<13x2xf32>
    %32 = tpu.concatenate %30, %31 in 0 : vector<3x2xf32>, vector<13x2xf32> -> vector<16x2xf32>
    %33 = vector.extract_strided_slice %1 {offsets = [3, 0], sizes = [1, 2], strides = [1, 1]} : vector<32x2xf32> to vector<1x2xf32>
    %34 = vector.broadcast %33 : vector<1x2xf32> to vector<16x2xf32>
    %35 = arith.mulf %34, %32 : vector<16x2xf32>
    %36 = arith.addf %25, %35 : vector<16x2xf32>
    %37 = vector.extract_strided_slice %1 {offsets = [19, 0], sizes = [1, 2], strides = [1, 1]} : vector<32x2xf32> to vector<1x2xf32>
    %38 = vector.broadcast %37 : vector<1x2xf32> to vector<16x2xf32>
    %39 = arith.mulf %38, %32 : vector<16x2xf32>
    %40 = arith.addf %29, %39 : vector<16x2xf32>
    %cst_5 = arith.constant 0.000000e+00 : f32
    %41 = vector.broadcast %cst_5 : f32 to vector<4x2xf32>
    %42 = vector.extract_strided_slice %0 {offsets = [0, 0], sizes = [12, 2], strides = [1, 1]} : vector<16x2xf32> to vector<12x2xf32>
    %43 = tpu.concatenate %41, %42 in 0 : vector<4x2xf32>, vector<12x2xf32> -> vector<16x2xf32>
    %44 = vector.extract_strided_slice %1 {offsets = [4, 0], sizes = [1, 2], strides = [1, 1]} : vector<32x2xf32> to vector<1x2xf32>
    %45 = vector.broadcast %44 : vector<1x2xf32> to vector<16x2xf32>
    %46 = arith.mulf %45, %43 : vector<16x2xf32>
    %47 = arith.addf %36, %46 : vector<16x2xf32>
    %48 = vector.extract_strided_slice %1 {offsets = [20, 0], sizes = [1, 2], strides = [1, 1]} : vector<32x2xf32> to vector<1x2xf32>
    %49 = vector.broadcast %48 : vector<1x2xf32> to vector<16x2xf32>
    %50 = arith.mulf %49, %43 : vector<16x2xf32>
    %51 = arith.addf %40, %50 : vector<16x2xf32>
    %cst_6 = arith.constant 0.000000e+00 : f32
    %52 = vector.broadcast %cst_6 : f32 to vector<5x2xf32>
    %53 = vector.extract_strided_slice %0 {offsets = [0, 0], sizes = [11, 2], strides = [1, 1]} : vector<16x2xf32> to vector<11x2xf32>
    %54 = tpu.concatenate %52, %53 in 0 : vector<5x2xf32>, vector<11x2xf32> -> vector<16x2xf32>
    %55 = vector.extract_strided_slice %1 {offsets = [5, 0], sizes = [1, 2], strides = [1, 1]} : vector<32x2xf32> to vector<1x2xf32>
    %56 = vector.broadcast %55 : vector<1x2xf32> to vector<16x2xf32>
    %57 = arith.mulf %56, %54 : vector<16x2xf32>
    %58 = arith.addf %47, %57 : vector<16x2xf32>
    %59 = vector.extract_strided_slice %1 {offsets = [21, 0], sizes = [1, 2], strides = [1, 1]} : vector<32x2xf32> to vector<1x2xf32>
    %60 = vector.broadcast %59 : vector<1x2xf32> to vector<16x2xf32>
    %61 = arith.mulf %60, %54 : vector<16x2xf32>
    %62 = arith.addf %51, %61 : vector<16x2xf32>
    %cst_7 = arith.constant 0.000000e+00 : f32
    %63 = vector.broadcast %cst_7 : f32 to vector<6x2xf32>
    %64 = vector.extract_strided_slice %0 {offsets = [0, 0], sizes = [10, 2], strides = [1, 1]} : vector<16x2xf32> to vector<10x2xf32>
    %65 = tpu.concatenate %63, %64 in 0 : vector<6x2xf32>, vector<10x2xf32> -> vector<16x2xf32>
    %66 = vector.extract_strided_slice %1 {offsets = [6, 0], sizes = [1, 2], strides = [1, 1]} : vector<32x2xf32> to vector<1x2xf32>
    %67 = vector.broadcast %66 : vector<1x2xf32> to vector<16x2xf32>
    %68 = arith.mulf %67, %65 : vector<16x2xf32>
    %69 = arith.addf %58, %68 : vector<16x2xf32>
    %70 = vector.extract_strided_slice %1 {offsets = [22, 0], sizes = [1, 2], strides = [1, 1]} : vector<32x2xf32> to vector<1x2xf32>
    %71 = vector.broadcast %70 : vector<1x2xf32> to vector<16x2xf32>
    %72 = arith.mulf %71, %65 : vector<16x2xf32>
    %73 = arith.addf %62, %72 : vector<16x2xf32>
    %cst_8 = arith.constant 0.000000e+00 : f32
    %74 = vector.broadcast %cst_8 : f32 to vector<7x2xf32>
    %75 = vector.extract_strided_slice %0 {offsets = [0, 0], sizes = [9, 2], strides = [1, 1]} : vector<16x2xf32> to vector<9x2xf32>
    %76 = tpu.concatenate %74, %75 in 0 : vector<7x2xf32>, vector<9x2xf32> -> vector<16x2xf32>
    %77 = vector.extract_strided_slice %1 {offsets = [7, 0], sizes = [1, 2], strides = [1, 1]} : vector<32x2xf32> to vector<1x2xf32>
    %78 = vector.broadcast %77 : vector<1x2xf32> to vector<16x2xf32>
    %79 = arith.mulf %78, %76 : vector<16x2xf32>
    %80 = arith.addf %69, %79 : vector<16x2xf32>
    %81 = vector.extract_strided_slice %1 {offsets = [23, 0], sizes = [1, 2], strides = [1, 1]} : vector<32x2xf32> to vector<1x2xf32>
    %82 = vector.broadcast %81 : vector<1x2xf32> to vector<16x2xf32>
    %83 = arith.mulf %82, %76 : vector<16x2xf32>
    %84 = arith.addf %73, %83 : vector<16x2xf32>
    %cst_9 = arith.constant 0.000000e+00 : f32
    %85 = vector.broadcast %cst_9 : f32 to vector<8x2xf32>
    %86 = vector.extract_strided_slice %0 {offsets = [0, 0], sizes = [8, 2], strides = [1, 1]} : vector<16x2xf32> to vector<8x2xf32>
    %87 = tpu.concatenate %85, %86 in 0 : vector<8x2xf32>, vector<8x2xf32> -> vector<16x2xf32>
    %88 = vector.extract_strided_slice %1 {offsets = [8, 0], sizes = [1, 2], strides = [1, 1]} : vector<32x2xf32> to vector<1x2xf32>
    %89 = vector.broadcast %88 : vector<1x2xf32> to vector<16x2xf32>
    %90 = arith.mulf %89, %87 : vector<16x2xf32>
    %91 = arith.addf %80, %90 : vector<16x2xf32>
    %92 = vector.extract_strided_slice %1 {offsets = [24, 0], sizes = [1, 2], strides = [1, 1]} : vector<32x2xf32> to vector<1x2xf32>
    %93 = vector.broadcast %92 : vector<1x2xf32> to vector<16x2xf32>
    %94 = arith.mulf %93, %87 : vector<16x2xf32>
    %95 = arith.addf %84, %94 : vector<16x2xf32>
    %cst_10 = arith.constant 0.000000e+00 : f32
    %96 = vector.broadcast %cst_10 : f32 to vector<9x2xf32>
    %97 = vector.extract_strided_slice %0 {offsets = [0, 0], sizes = [7, 2], strides = [1, 1]} : vector<16x2xf32> to vector<7x2xf32>
    %98 = tpu.concatenate %96, %97 in 0 : vector<9x2xf32>, vector<7x2xf32> -> vector<16x2xf32>
    %99 = vector.extract_strided_slice %1 {offsets = [9, 0], sizes = [1, 2], strides = [1, 1]} : vector<32x2xf32> to vector<1x2xf32>
    %100 = vector.broadcast %99 : vector<1x2xf32> to vector<16x2xf32>
    %101 = arith.mulf %100, %98 : vector<16x2xf32>
    %102 = arith.addf %91, %101 : vector<16x2xf32>
    %103 = vector.extract_strided_slice %1 {offsets = [25, 0], sizes = [1, 2], strides = [1, 1]} : vector<32x2xf32> to vector<1x2xf32>
    %104 = vector.broadcast %103 : vector<1x2xf32> to vector<16x2xf32>
    %105 = arith.mulf %104, %98 : vector<16x2xf32>
    %106 = arith.addf %95, %105 : vector<16x2xf32>
    %cst_11 = arith.constant 0.000000e+00 : f32
    %107 = vector.broadcast %cst_11 : f32 to vector<10x2xf32>
    %108 = vector.extract_strided_slice %0 {offsets = [0, 0], sizes = [6, 2], strides = [1, 1]} : vector<16x2xf32> to vector<6x2xf32>
    %109 = tpu.concatenate %107, %108 in 0 : vector<10x2xf32>, vector<6x2xf32> -> vector<16x2xf32>
    %110 = vector.extract_strided_slice %1 {offsets = [10, 0], sizes = [1, 2], strides = [1, 1]} : vector<32x2xf32> to vector<1x2xf32>
    %111 = vector.broadcast %110 : vector<1x2xf32> to vector<16x2xf32>
    %112 = arith.mulf %111, %109 : vector<16x2xf32>
    %113 = arith.addf %102, %112 : vector<16x2xf32>
    %114 = vector.extract_strided_slice %1 {offsets = [26, 0], sizes = [1, 2], strides = [1, 1]} : vector<32x2xf32> to vector<1x2xf32>
    %115 = vector.broadcast %114 : vector<1x2xf32> to vector<16x2xf32>
    %116 = arith.mulf %115, %109 : vector<16x2xf32>
    %117 = arith.addf %106, %116 : vector<16x2xf32>
    %cst_12 = arith.constant 0.000000e+00 : f32
    %118 = vector.broadcast %cst_12 : f32 to vector<11x2xf32>
    %119 = vector.extract_strided_slice %0 {offsets = [0, 0], sizes = [5, 2], strides = [1, 1]} : vector<16x2xf32> to vector<5x2xf32>
    %120 = tpu.concatenate %118, %119 in 0 : vector<11x2xf32>, vector<5x2xf32> -> vector<16x2xf32>
    %121 = vector.extract_strided_slice %1 {offsets = [11, 0], sizes = [1, 2], strides = [1, 1]} : vector<32x2xf32> to vector<1x2xf32>
    %122 = vector.broadcast %121 : vector<1x2xf32> to vector<16x2xf32>
    %123 = arith.mulf %122, %120 : vector<16x2xf32>
    %124 = arith.addf %113, %123 : vector<16x2xf32>
    %125 = vector.extract_strided_slice %1 {offsets = [27, 0], sizes = [1, 2], strides = [1, 1]} : vector<32x2xf32> to vector<1x2xf32>
    %126 = vector.broadcast %125 : vector<1x2xf32> to vector<16x2xf32>
    %127 = arith.mulf %126, %120 : vector<16x2xf32>
    %128 = arith.addf %117, %127 : vector<16x2xf32>
    %cst_13 = arith.constant 0.000000e+00 : f32
    %129 = vector.broadcast %cst_13 : f32 to vector<12x2xf32>
    %130 = vector.extract_strided_slice %0 {offsets = [0, 0], sizes = [4, 2], strides = [1, 1]} : vector<16x2xf32> to vector<4x2xf32>
    %131 = tpu.concatenate %129, %130 in 0 : vector<12x2xf32>, vector<4x2xf32> -> vector<16x2xf32>
    %132 = vector.extract_strided_slice %1 {offsets = [12, 0], sizes = [1, 2], strides = [1, 1]} : vector<32x2xf32> to vector<1x2xf32>
    %133 = vector.broadcast %132 : vector<1x2xf32> to vector<16x2xf32>
    %134 = arith.mulf %133, %131 : vector<16x2xf32>
    %135 = arith.addf %124, %134 : vector<16x2xf32>
    %136 = vector.extract_strided_slice %1 {offsets = [28, 0], sizes = [1, 2], strides = [1, 1]} : vector<32x2xf32> to vector<1x2xf32>
    %137 = vector.broadcast %136 : vector<1x2xf32> to vector<16x2xf32>
    %138 = arith.mulf %137, %131 : vector<16x2xf32>
    %139 = arith.addf %128, %138 : vector<16x2xf32>
    %cst_14 = arith.constant 0.000000e+00 : f32
    %140 = vector.broadcast %cst_14 : f32 to vector<13x2xf32>
    %141 = vector.extract_strided_slice %0 {offsets = [0, 0], sizes = [3, 2], strides = [1, 1]} : vector<16x2xf32> to vector<3x2xf32>
    %142 = tpu.concatenate %140, %141 in 0 : vector<13x2xf32>, vector<3x2xf32> -> vector<16x2xf32>
    %143 = vector.extract_strided_slice %1 {offsets = [13, 0], sizes = [1, 2], strides = [1, 1]} : vector<32x2xf32> to vector<1x2xf32>
    %144 = vector.broadcast %143 : vector<1x2xf32> to vector<16x2xf32>
    %145 = arith.mulf %144, %142 : vector<16x2xf32>
    %146 = arith.addf %135, %145 : vector<16x2xf32>
    %147 = vector.extract_strided_slice %1 {offsets = [29, 0], sizes = [1, 2], strides = [1, 1]} : vector<32x2xf32> to vector<1x2xf32>
    %148 = vector.broadcast %147 : vector<1x2xf32> to vector<16x2xf32>
    %149 = arith.mulf %148, %142 : vector<16x2xf32>
    %150 = arith.addf %139, %149 : vector<16x2xf32>
    %cst_15 = arith.constant 0.000000e+00 : f32
    %151 = vector.broadcast %cst_15 : f32 to vector<14x2xf32>
    %152 = vector.extract_strided_slice %0 {offsets = [0, 0], sizes = [2, 2], strides = [1, 1]} : vector<16x2xf32> to vector<2x2xf32>
    %153 = tpu.concatenate %151, %152 in 0 : vector<14x2xf32>, vector<2x2xf32> -> vector<16x2xf32>
    %154 = vector.extract_strided_slice %1 {offsets = [14, 0], sizes = [1, 2], strides = [1, 1]} : vector<32x2xf32> to vector<1x2xf32>
    %155 = vector.broadcast %154 : vector<1x2xf32> to vector<16x2xf32>
    %156 = arith.mulf %155, %153 : vector<16x2xf32>
    %157 = arith.addf %146, %156 : vector<16x2xf32>
    %158 = vector.extract_strided_slice %1 {offsets = [30, 0], sizes = [1, 2], strides = [1, 1]} : vector<32x2xf32> to vector<1x2xf32>
    %159 = vector.broadcast %158 : vector<1x2xf32> to vector<16x2xf32>
    %160 = arith.mulf %159, %153 : vector<16x2xf32>
    %161 = arith.addf %150, %160 : vector<16x2xf32>
    %cst_16 = arith.constant 0.000000e+00 : f32
    %162 = vector.broadcast %cst_16 : f32 to vector<15x2xf32>
    %163 = vector.extract_strided_slice %0 {offsets = [0, 0], sizes = [1, 2], strides = [1, 1]} : vector<16x2xf32> to vector<1x2xf32>
    %164 = tpu.concatenate %162, %163 in 0 : vector<15x2xf32>, vector<1x2xf32> -> vector<16x2xf32>
    %165 = vector.extract_strided_slice %1 {offsets = [15, 0], sizes = [1, 2], strides = [1, 1]} : vector<32x2xf32> to vector<1x2xf32>
    %166 = vector.broadcast %165 : vector<1x2xf32> to vector<16x2xf32>
    %167 = arith.mulf %166, %164 : vector<16x2xf32>
    %168 = arith.addf %157, %167 : vector<16x2xf32>
    %169 = vector.extract_strided_slice %1 {offsets = [31, 0], sizes = [1, 2], strides = [1, 1]} : vector<32x2xf32> to vector<1x2xf32>
    %170 = vector.broadcast %169 : vector<1x2xf32> to vector<16x2xf32>
    %171 = arith.mulf %170, %164 : vector<16x2xf32>
    %172 = arith.addf %161, %171 : vector<16x2xf32>
    %c0_17 = arith.constant 0 : index
    %c0_18 = arith.constant 0 : index
    %173 = vector.load %arg3[%c0_17, %c0_18] : memref<2x64xf32, #tpu.memory_space<vmem>>, vector<2x64xf32>
    %cst_19 = arith.constant dense<0.000000e+00> : vector<16x64xf32>
    %174 = tpu.matmul %168, %173, %cst_19 {dimension_numbers = #tpu.dot_dimension_numbers<[1], [0], [0], [1], [0, 0, 1, 1], [], []>} : vector<16x2xf32>, vector<2x64xf32>, vector<16x64xf32> -> vector<16x64xf32>
    %c0_20 = arith.constant 0 : index
    %c0_21 = arith.constant 0 : index
    %175 = vector.load %arg4[%c0_20, %c0_21] : memref<2x64xf32, #tpu.memory_space<vmem>>, vector<2x64xf32>
    %cst_22 = arith.constant dense<0.000000e+00> : vector<16x64xf32>
    %176 = tpu.matmul %172, %175, %cst_22 {dimension_numbers = #tpu.dot_dimension_numbers<[1], [0], [0], [1], [0, 0, 1, 1], [], []>} : vector<16x2xf32>, vector<2x64xf32>, vector<16x64xf32> -> vector<16x64xf32>
    %177 = arith.addf %174, %176 : vector<16x64xf32>
    %c0_23 = arith.constant 0 : index
    %c0_24 = arith.constant 0 : index
    %178 = vector.load %arg5[%c0_23, %c0_24] : memref<1x64xf32, #tpu.memory_space<vmem>>, vector<1x64xf32>
    %179 = vector.broadcast %178 : vector<1x64xf32> to vector<16x64xf32>
    %180 = arith.addf %177, %179 : vector<16x64xf32>
    %181 = math.tanh %180 : vector<16x64xf32>
    %c0_25 = arith.constant 0 : index
    %c0_26 = arith.constant 0 : index
    %182 = vector.load %arg6[%c0_25, %c0_26] : memref<64x2xf32, #tpu.memory_space<vmem>>, vector<64x2xf32>
    %cst_27 = arith.constant dense<0.000000e+00> : vector<16x2xf32>
    %183 = tpu.matmul %181, %182, %cst_27 {dimension_numbers = #tpu.dot_dimension_numbers<[1], [0], [0], [1], [0, 0, 1, 1], [], []>} : vector<16x64xf32>, vector<64x2xf32>, vector<16x2xf32> -> vector<16x2xf32>
    %c0_28 = arith.constant 0 : index
    %c0_29 = arith.constant 0 : index
    %184 = vector.load %arg8[%c0_28, %c0_29] : memref<1x2xf32, #tpu.memory_space<vmem>>, vector<1x2xf32>
    %185 = vector.broadcast %184 : vector<1x2xf32> to vector<16x2xf32>
    %186 = arith.addf %183, %185 : vector<16x2xf32>
    %c0_30 = arith.constant 0 : index
    %c0_31 = arith.constant 0 : index
    %187 = vector.load %arg7[%c0_30, %c0_31] : memref<64x2xf32, #tpu.memory_space<vmem>>, vector<64x2xf32>
    %cst_32 = arith.constant dense<0.000000e+00> : vector<16x2xf32>
    %188 = tpu.matmul %181, %187, %cst_32 {dimension_numbers = #tpu.dot_dimension_numbers<[1], [0], [0], [1], [0, 0, 1, 1], [], []>} : vector<16x64xf32>, vector<64x2xf32>, vector<16x2xf32> -> vector<16x2xf32>
    %c0_33 = arith.constant 0 : index
    %c0_34 = arith.constant 0 : index
    %189 = vector.load %arg9[%c0_33, %c0_34] : memref<1x2xf32, #tpu.memory_space<vmem>>, vector<1x2xf32>
    %190 = vector.broadcast %189 : vector<1x2xf32> to vector<16x2xf32>
    %191 = arith.addf %188, %190 : vector<16x2xf32>
    %c0_35 = arith.constant 0 : index
    %c0_36 = arith.constant 0 : index
    %192 = vector.load %arg2[%c0_35, %c0_36] : memref<32x2xf32, #tpu.memory_space<vmem>>, vector<32x2xf32>
    %193 = vector.extract_strided_slice %192 {offsets = [0, 0], sizes = [1, 2], strides = [1, 1]} : vector<32x2xf32> to vector<1x2xf32>
    %194 = vector.broadcast %193 : vector<1x2xf32> to vector<16x2xf32>
    %195 = arith.mulf %194, %186 : vector<16x2xf32>
    %196 = vector.extract_strided_slice %192 {offsets = [16, 0], sizes = [1, 2], strides = [1, 1]} : vector<32x2xf32> to vector<1x2xf32>
    %197 = vector.broadcast %196 : vector<1x2xf32> to vector<16x2xf32>
    %198 = arith.mulf %197, %191 : vector<16x2xf32>
    %199 = arith.addf %195, %198 : vector<16x2xf32>
    %200 = vector.extract_strided_slice %192 {offsets = [1, 0], sizes = [1, 2], strides = [1, 1]} : vector<32x2xf32> to vector<1x2xf32>
    %cst_37 = arith.constant 0.000000e+00 : f32
    %201 = vector.broadcast %cst_37 : f32 to vector<1x2xf32>
    %202 = vector.extract_strided_slice %186 {offsets = [0, 0], sizes = [15, 2], strides = [1, 1]} : vector<16x2xf32> to vector<15x2xf32>
    %203 = tpu.concatenate %201, %202 in 0 : vector<1x2xf32>, vector<15x2xf32> -> vector<16x2xf32>
    %204 = vector.broadcast %200 : vector<1x2xf32> to vector<16x2xf32>
    %205 = arith.mulf %204, %203 : vector<16x2xf32>
    %206 = arith.addf %199, %205 : vector<16x2xf32>
    %207 = vector.extract_strided_slice %192 {offsets = [17, 0], sizes = [1, 2], strides = [1, 1]} : vector<32x2xf32> to vector<1x2xf32>
    %cst_38 = arith.constant 0.000000e+00 : f32
    %208 = vector.broadcast %cst_38 : f32 to vector<1x2xf32>
    %209 = vector.extract_strided_slice %191 {offsets = [0, 0], sizes = [15, 2], strides = [1, 1]} : vector<16x2xf32> to vector<15x2xf32>
    %210 = tpu.concatenate %208, %209 in 0 : vector<1x2xf32>, vector<15x2xf32> -> vector<16x2xf32>
    %211 = vector.broadcast %207 : vector<1x2xf32> to vector<16x2xf32>
    %212 = arith.mulf %211, %210 : vector<16x2xf32>
    %213 = arith.addf %206, %212 : vector<16x2xf32>
    %214 = vector.extract_strided_slice %192 {offsets = [2, 0], sizes = [1, 2], strides = [1, 1]} : vector<32x2xf32> to vector<1x2xf32>
    %cst_39 = arith.constant 0.000000e+00 : f32
    %215 = vector.broadcast %cst_39 : f32 to vector<2x2xf32>
    %216 = vector.extract_strided_slice %186 {offsets = [0, 0], sizes = [14, 2], strides = [1, 1]} : vector<16x2xf32> to vector<14x2xf32>
    %217 = tpu.concatenate %215, %216 in 0 : vector<2x2xf32>, vector<14x2xf32> -> vector<16x2xf32>
    %218 = vector.broadcast %214 : vector<1x2xf32> to vector<16x2xf32>
    %219 = arith.mulf %218, %217 : vector<16x2xf32>
    %220 = arith.addf %213, %219 : vector<16x2xf32>
    %221 = vector.extract_strided_slice %192 {offsets = [18, 0], sizes = [1, 2], strides = [1, 1]} : vector<32x2xf32> to vector<1x2xf32>
    %cst_40 = arith.constant 0.000000e+00 : f32
    %222 = vector.broadcast %cst_40 : f32 to vector<2x2xf32>
    %223 = vector.extract_strided_slice %191 {offsets = [0, 0], sizes = [14, 2], strides = [1, 1]} : vector<16x2xf32> to vector<14x2xf32>
    %224 = tpu.concatenate %222, %223 in 0 : vector<2x2xf32>, vector<14x2xf32> -> vector<16x2xf32>
    %225 = vector.broadcast %221 : vector<1x2xf32> to vector<16x2xf32>
    %226 = arith.mulf %225, %224 : vector<16x2xf32>
    %227 = arith.addf %220, %226 : vector<16x2xf32>
    %228 = vector.extract_strided_slice %192 {offsets = [3, 0], sizes = [1, 2], strides = [1, 1]} : vector<32x2xf32> to vector<1x2xf32>
    %cst_41 = arith.constant 0.000000e+00 : f32
    %229 = vector.broadcast %cst_41 : f32 to vector<3x2xf32>
    %230 = vector.extract_strided_slice %186 {offsets = [0, 0], sizes = [13, 2], strides = [1, 1]} : vector<16x2xf32> to vector<13x2xf32>
    %231 = tpu.concatenate %229, %230 in 0 : vector<3x2xf32>, vector<13x2xf32> -> vector<16x2xf32>
    %232 = vector.broadcast %228 : vector<1x2xf32> to vector<16x2xf32>
    %233 = arith.mulf %232, %231 : vector<16x2xf32>
    %234 = arith.addf %227, %233 : vector<16x2xf32>
    %235 = vector.extract_strided_slice %192 {offsets = [19, 0], sizes = [1, 2], strides = [1, 1]} : vector<32x2xf32> to vector<1x2xf32>
    %cst_42 = arith.constant 0.000000e+00 : f32
    %236 = vector.broadcast %cst_42 : f32 to vector<3x2xf32>
    %237 = vector.extract_strided_slice %191 {offsets = [0, 0], sizes = [13, 2], strides = [1, 1]} : vector<16x2xf32> to vector<13x2xf32>
    %238 = tpu.concatenate %236, %237 in 0 : vector<3x2xf32>, vector<13x2xf32> -> vector<16x2xf32>
    %239 = vector.broadcast %235 : vector<1x2xf32> to vector<16x2xf32>
    %240 = arith.mulf %239, %238 : vector<16x2xf32>
    %241 = arith.addf %234, %240 : vector<16x2xf32>
    %242 = vector.extract_strided_slice %192 {offsets = [4, 0], sizes = [1, 2], strides = [1, 1]} : vector<32x2xf32> to vector<1x2xf32>
    %cst_43 = arith.constant 0.000000e+00 : f32
    %243 = vector.broadcast %cst_43 : f32 to vector<4x2xf32>
    %244 = vector.extract_strided_slice %186 {offsets = [0, 0], sizes = [12, 2], strides = [1, 1]} : vector<16x2xf32> to vector<12x2xf32>
    %245 = tpu.concatenate %243, %244 in 0 : vector<4x2xf32>, vector<12x2xf32> -> vector<16x2xf32>
    %246 = vector.broadcast %242 : vector<1x2xf32> to vector<16x2xf32>
    %247 = arith.mulf %246, %245 : vector<16x2xf32>
    %248 = arith.addf %241, %247 : vector<16x2xf32>
    %249 = vector.extract_strided_slice %192 {offsets = [20, 0], sizes = [1, 2], strides = [1, 1]} : vector<32x2xf32> to vector<1x2xf32>
    %cst_44 = arith.constant 0.000000e+00 : f32
    %250 = vector.broadcast %cst_44 : f32 to vector<4x2xf32>
    %251 = vector.extract_strided_slice %191 {offsets = [0, 0], sizes = [12, 2], strides = [1, 1]} : vector<16x2xf32> to vector<12x2xf32>
    %252 = tpu.concatenate %250, %251 in 0 : vector<4x2xf32>, vector<12x2xf32> -> vector<16x2xf32>
    %253 = vector.broadcast %249 : vector<1x2xf32> to vector<16x2xf32>
    %254 = arith.mulf %253, %252 : vector<16x2xf32>
    %255 = arith.addf %248, %254 : vector<16x2xf32>
    %256 = vector.extract_strided_slice %192 {offsets = [5, 0], sizes = [1, 2], strides = [1, 1]} : vector<32x2xf32> to vector<1x2xf32>
    %cst_45 = arith.constant 0.000000e+00 : f32
    %257 = vector.broadcast %cst_45 : f32 to vector<5x2xf32>
    %258 = vector.extract_strided_slice %186 {offsets = [0, 0], sizes = [11, 2], strides = [1, 1]} : vector<16x2xf32> to vector<11x2xf32>
    %259 = tpu.concatenate %257, %258 in 0 : vector<5x2xf32>, vector<11x2xf32> -> vector<16x2xf32>
    %260 = vector.broadcast %256 : vector<1x2xf32> to vector<16x2xf32>
    %261 = arith.mulf %260, %259 : vector<16x2xf32>
    %262 = arith.addf %255, %261 : vector<16x2xf32>
    %263 = vector.extract_strided_slice %192 {offsets = [21, 0], sizes = [1, 2], strides = [1, 1]} : vector<32x2xf32> to vector<1x2xf32>
    %cst_46 = arith.constant 0.000000e+00 : f32
    %264 = vector.broadcast %cst_46 : f32 to vector<5x2xf32>
    %265 = vector.extract_strided_slice %191 {offsets = [0, 0], sizes = [11, 2], strides = [1, 1]} : vector<16x2xf32> to vector<11x2xf32>
    %266 = tpu.concatenate %264, %265 in 0 : vector<5x2xf32>, vector<11x2xf32> -> vector<16x2xf32>
    %267 = vector.broadcast %263 : vector<1x2xf32> to vector<16x2xf32>
    %268 = arith.mulf %267, %266 : vector<16x2xf32>
    %269 = arith.addf %262, %268 : vector<16x2xf32>
    %270 = vector.extract_strided_slice %192 {offsets = [6, 0], sizes = [1, 2], strides = [1, 1]} : vector<32x2xf32> to vector<1x2xf32>
    %cst_47 = arith.constant 0.000000e+00 : f32
    %271 = vector.broadcast %cst_47 : f32 to vector<6x2xf32>
    %272 = vector.extract_strided_slice %186 {offsets = [0, 0], sizes = [10, 2], strides = [1, 1]} : vector<16x2xf32> to vector<10x2xf32>
    %273 = tpu.concatenate %271, %272 in 0 : vector<6x2xf32>, vector<10x2xf32> -> vector<16x2xf32>
    %274 = vector.broadcast %270 : vector<1x2xf32> to vector<16x2xf32>
    %275 = arith.mulf %274, %273 : vector<16x2xf32>
    %276 = arith.addf %269, %275 : vector<16x2xf32>
    %277 = vector.extract_strided_slice %192 {offsets = [22, 0], sizes = [1, 2], strides = [1, 1]} : vector<32x2xf32> to vector<1x2xf32>
    %cst_48 = arith.constant 0.000000e+00 : f32
    %278 = vector.broadcast %cst_48 : f32 to vector<6x2xf32>
    %279 = vector.extract_strided_slice %191 {offsets = [0, 0], sizes = [10, 2], strides = [1, 1]} : vector<16x2xf32> to vector<10x2xf32>
    %280 = tpu.concatenate %278, %279 in 0 : vector<6x2xf32>, vector<10x2xf32> -> vector<16x2xf32>
    %281 = vector.broadcast %277 : vector<1x2xf32> to vector<16x2xf32>
    %282 = arith.mulf %281, %280 : vector<16x2xf32>
    %283 = arith.addf %276, %282 : vector<16x2xf32>
    %284 = vector.extract_strided_slice %192 {offsets = [7, 0], sizes = [1, 2], strides = [1, 1]} : vector<32x2xf32> to vector<1x2xf32>
    %cst_49 = arith.constant 0.000000e+00 : f32
    %285 = vector.broadcast %cst_49 : f32 to vector<7x2xf32>
    %286 = vector.extract_strided_slice %186 {offsets = [0, 0], sizes = [9, 2], strides = [1, 1]} : vector<16x2xf32> to vector<9x2xf32>
    %287 = tpu.concatenate %285, %286 in 0 : vector<7x2xf32>, vector<9x2xf32> -> vector<16x2xf32>
    %288 = vector.broadcast %284 : vector<1x2xf32> to vector<16x2xf32>
    %289 = arith.mulf %288, %287 : vector<16x2xf32>
    %290 = arith.addf %283, %289 : vector<16x2xf32>
    %291 = vector.extract_strided_slice %192 {offsets = [23, 0], sizes = [1, 2], strides = [1, 1]} : vector<32x2xf32> to vector<1x2xf32>
    %cst_50 = arith.constant 0.000000e+00 : f32
    %292 = vector.broadcast %cst_50 : f32 to vector<7x2xf32>
    %293 = vector.extract_strided_slice %191 {offsets = [0, 0], sizes = [9, 2], strides = [1, 1]} : vector<16x2xf32> to vector<9x2xf32>
    %294 = tpu.concatenate %292, %293 in 0 : vector<7x2xf32>, vector<9x2xf32> -> vector<16x2xf32>
    %295 = vector.broadcast %291 : vector<1x2xf32> to vector<16x2xf32>
    %296 = arith.mulf %295, %294 : vector<16x2xf32>
    %297 = arith.addf %290, %296 : vector<16x2xf32>
    %298 = vector.extract_strided_slice %192 {offsets = [8, 0], sizes = [1, 2], strides = [1, 1]} : vector<32x2xf32> to vector<1x2xf32>
    %cst_51 = arith.constant 0.000000e+00 : f32
    %299 = vector.broadcast %cst_51 : f32 to vector<8x2xf32>
    %300 = vector.extract_strided_slice %186 {offsets = [0, 0], sizes = [8, 2], strides = [1, 1]} : vector<16x2xf32> to vector<8x2xf32>
    %301 = tpu.concatenate %299, %300 in 0 : vector<8x2xf32>, vector<8x2xf32> -> vector<16x2xf32>
    %302 = vector.broadcast %298 : vector<1x2xf32> to vector<16x2xf32>
    %303 = arith.mulf %302, %301 : vector<16x2xf32>
    %304 = arith.addf %297, %303 : vector<16x2xf32>
    %305 = vector.extract_strided_slice %192 {offsets = [24, 0], sizes = [1, 2], strides = [1, 1]} : vector<32x2xf32> to vector<1x2xf32>
    %cst_52 = arith.constant 0.000000e+00 : f32
    %306 = vector.broadcast %cst_52 : f32 to vector<8x2xf32>
    %307 = vector.extract_strided_slice %191 {offsets = [0, 0], sizes = [8, 2], strides = [1, 1]} : vector<16x2xf32> to vector<8x2xf32>
    %308 = tpu.concatenate %306, %307 in 0 : vector<8x2xf32>, vector<8x2xf32> -> vector<16x2xf32>
    %309 = vector.broadcast %305 : vector<1x2xf32> to vector<16x2xf32>
    %310 = arith.mulf %309, %308 : vector<16x2xf32>
    %311 = arith.addf %304, %310 : vector<16x2xf32>
    %312 = vector.extract_strided_slice %192 {offsets = [9, 0], sizes = [1, 2], strides = [1, 1]} : vector<32x2xf32> to vector<1x2xf32>
    %cst_53 = arith.constant 0.000000e+00 : f32
    %313 = vector.broadcast %cst_53 : f32 to vector<9x2xf32>
    %314 = vector.extract_strided_slice %186 {offsets = [0, 0], sizes = [7, 2], strides = [1, 1]} : vector<16x2xf32> to vector<7x2xf32>
    %315 = tpu.concatenate %313, %314 in 0 : vector<9x2xf32>, vector<7x2xf32> -> vector<16x2xf32>
    %316 = vector.broadcast %312 : vector<1x2xf32> to vector<16x2xf32>
    %317 = arith.mulf %316, %315 : vector<16x2xf32>
    %318 = arith.addf %311, %317 : vector<16x2xf32>
    %319 = vector.extract_strided_slice %192 {offsets = [25, 0], sizes = [1, 2], strides = [1, 1]} : vector<32x2xf32> to vector<1x2xf32>
    %cst_54 = arith.constant 0.000000e+00 : f32
    %320 = vector.broadcast %cst_54 : f32 to vector<9x2xf32>
    %321 = vector.extract_strided_slice %191 {offsets = [0, 0], sizes = [7, 2], strides = [1, 1]} : vector<16x2xf32> to vector<7x2xf32>
    %322 = tpu.concatenate %320, %321 in 0 : vector<9x2xf32>, vector<7x2xf32> -> vector<16x2xf32>
    %323 = vector.broadcast %319 : vector<1x2xf32> to vector<16x2xf32>
    %324 = arith.mulf %323, %322 : vector<16x2xf32>
    %325 = arith.addf %318, %324 : vector<16x2xf32>
    %326 = vector.extract_strided_slice %192 {offsets = [10, 0], sizes = [1, 2], strides = [1, 1]} : vector<32x2xf32> to vector<1x2xf32>
    %cst_55 = arith.constant 0.000000e+00 : f32
    %327 = vector.broadcast %cst_55 : f32 to vector<10x2xf32>
    %328 = vector.extract_strided_slice %186 {offsets = [0, 0], sizes = [6, 2], strides = [1, 1]} : vector<16x2xf32> to vector<6x2xf32>
    %329 = tpu.concatenate %327, %328 in 0 : vector<10x2xf32>, vector<6x2xf32> -> vector<16x2xf32>
    %330 = vector.broadcast %326 : vector<1x2xf32> to vector<16x2xf32>
    %331 = arith.mulf %330, %329 : vector<16x2xf32>
    %332 = arith.addf %325, %331 : vector<16x2xf32>
    %333 = vector.extract_strided_slice %192 {offsets = [26, 0], sizes = [1, 2], strides = [1, 1]} : vector<32x2xf32> to vector<1x2xf32>
    %cst_56 = arith.constant 0.000000e+00 : f32
    %334 = vector.broadcast %cst_56 : f32 to vector<10x2xf32>
    %335 = vector.extract_strided_slice %191 {offsets = [0, 0], sizes = [6, 2], strides = [1, 1]} : vector<16x2xf32> to vector<6x2xf32>
    %336 = tpu.concatenate %334, %335 in 0 : vector<10x2xf32>, vector<6x2xf32> -> vector<16x2xf32>
    %337 = vector.broadcast %333 : vector<1x2xf32> to vector<16x2xf32>
    %338 = arith.mulf %337, %336 : vector<16x2xf32>
    %339 = arith.addf %332, %338 : vector<16x2xf32>
    %340 = vector.extract_strided_slice %192 {offsets = [11, 0], sizes = [1, 2], strides = [1, 1]} : vector<32x2xf32> to vector<1x2xf32>
    %cst_57 = arith.constant 0.000000e+00 : f32
    %341 = vector.broadcast %cst_57 : f32 to vector<11x2xf32>
    %342 = vector.extract_strided_slice %186 {offsets = [0, 0], sizes = [5, 2], strides = [1, 1]} : vector<16x2xf32> to vector<5x2xf32>
    %343 = tpu.concatenate %341, %342 in 0 : vector<11x2xf32>, vector<5x2xf32> -> vector<16x2xf32>
    %344 = vector.broadcast %340 : vector<1x2xf32> to vector<16x2xf32>
    %345 = arith.mulf %344, %343 : vector<16x2xf32>
    %346 = arith.addf %339, %345 : vector<16x2xf32>
    %347 = vector.extract_strided_slice %192 {offsets = [27, 0], sizes = [1, 2], strides = [1, 1]} : vector<32x2xf32> to vector<1x2xf32>
    %cst_58 = arith.constant 0.000000e+00 : f32
    %348 = vector.broadcast %cst_58 : f32 to vector<11x2xf32>
    %349 = vector.extract_strided_slice %191 {offsets = [0, 0], sizes = [5, 2], strides = [1, 1]} : vector<16x2xf32> to vector<5x2xf32>
    %350 = tpu.concatenate %348, %349 in 0 : vector<11x2xf32>, vector<5x2xf32> -> vector<16x2xf32>
    %351 = vector.broadcast %347 : vector<1x2xf32> to vector<16x2xf32>
    %352 = arith.mulf %351, %350 : vector<16x2xf32>
    %353 = arith.addf %346, %352 : vector<16x2xf32>
    %354 = vector.extract_strided_slice %192 {offsets = [12, 0], sizes = [1, 2], strides = [1, 1]} : vector<32x2xf32> to vector<1x2xf32>
    %cst_59 = arith.constant 0.000000e+00 : f32
    %355 = vector.broadcast %cst_59 : f32 to vector<12x2xf32>
    %356 = vector.extract_strided_slice %186 {offsets = [0, 0], sizes = [4, 2], strides = [1, 1]} : vector<16x2xf32> to vector<4x2xf32>
    %357 = tpu.concatenate %355, %356 in 0 : vector<12x2xf32>, vector<4x2xf32> -> vector<16x2xf32>
    %358 = vector.broadcast %354 : vector<1x2xf32> to vector<16x2xf32>
    %359 = arith.mulf %358, %357 : vector<16x2xf32>
    %360 = arith.addf %353, %359 : vector<16x2xf32>
    %361 = vector.extract_strided_slice %192 {offsets = [28, 0], sizes = [1, 2], strides = [1, 1]} : vector<32x2xf32> to vector<1x2xf32>
    %cst_60 = arith.constant 0.000000e+00 : f32
    %362 = vector.broadcast %cst_60 : f32 to vector<12x2xf32>
    %363 = vector.extract_strided_slice %191 {offsets = [0, 0], sizes = [4, 2], strides = [1, 1]} : vector<16x2xf32> to vector<4x2xf32>
    %364 = tpu.concatenate %362, %363 in 0 : vector<12x2xf32>, vector<4x2xf32> -> vector<16x2xf32>
    %365 = vector.broadcast %361 : vector<1x2xf32> to vector<16x2xf32>
    %366 = arith.mulf %365, %364 : vector<16x2xf32>
    %367 = arith.addf %360, %366 : vector<16x2xf32>
    %368 = vector.extract_strided_slice %192 {offsets = [13, 0], sizes = [1, 2], strides = [1, 1]} : vector<32x2xf32> to vector<1x2xf32>
    %cst_61 = arith.constant 0.000000e+00 : f32
    %369 = vector.broadcast %cst_61 : f32 to vector<13x2xf32>
    %370 = vector.extract_strided_slice %186 {offsets = [0, 0], sizes = [3, 2], strides = [1, 1]} : vector<16x2xf32> to vector<3x2xf32>
    %371 = tpu.concatenate %369, %370 in 0 : vector<13x2xf32>, vector<3x2xf32> -> vector<16x2xf32>
    %372 = vector.broadcast %368 : vector<1x2xf32> to vector<16x2xf32>
    %373 = arith.mulf %372, %371 : vector<16x2xf32>
    %374 = arith.addf %367, %373 : vector<16x2xf32>
    %375 = vector.extract_strided_slice %192 {offsets = [29, 0], sizes = [1, 2], strides = [1, 1]} : vector<32x2xf32> to vector<1x2xf32>
    %cst_62 = arith.constant 0.000000e+00 : f32
    %376 = vector.broadcast %cst_62 : f32 to vector<13x2xf32>
    %377 = vector.extract_strided_slice %191 {offsets = [0, 0], sizes = [3, 2], strides = [1, 1]} : vector<16x2xf32> to vector<3x2xf32>
    %378 = tpu.concatenate %376, %377 in 0 : vector<13x2xf32>, vector<3x2xf32> -> vector<16x2xf32>
    %379 = vector.broadcast %375 : vector<1x2xf32> to vector<16x2xf32>
    %380 = arith.mulf %379, %378 : vector<16x2xf32>
    %381 = arith.addf %374, %380 : vector<16x2xf32>
    %382 = vector.extract_strided_slice %192 {offsets = [14, 0], sizes = [1, 2], strides = [1, 1]} : vector<32x2xf32> to vector<1x2xf32>
    %cst_63 = arith.constant 0.000000e+00 : f32
    %383 = vector.broadcast %cst_63 : f32 to vector<14x2xf32>
    %384 = vector.extract_strided_slice %186 {offsets = [0, 0], sizes = [2, 2], strides = [1, 1]} : vector<16x2xf32> to vector<2x2xf32>
    %385 = tpu.concatenate %383, %384 in 0 : vector<14x2xf32>, vector<2x2xf32> -> vector<16x2xf32>
    %386 = vector.broadcast %382 : vector<1x2xf32> to vector<16x2xf32>
    %387 = arith.mulf %386, %385 : vector<16x2xf32>
    %388 = arith.addf %381, %387 : vector<16x2xf32>
    %389 = vector.extract_strided_slice %192 {offsets = [30, 0], sizes = [1, 2], strides = [1, 1]} : vector<32x2xf32> to vector<1x2xf32>
    %cst_64 = arith.constant 0.000000e+00 : f32
    %390 = vector.broadcast %cst_64 : f32 to vector<14x2xf32>
    %391 = vector.extract_strided_slice %191 {offsets = [0, 0], sizes = [2, 2], strides = [1, 1]} : vector<16x2xf32> to vector<2x2xf32>
    %392 = tpu.concatenate %390, %391 in 0 : vector<14x2xf32>, vector<2x2xf32> -> vector<16x2xf32>
    %393 = vector.broadcast %389 : vector<1x2xf32> to vector<16x2xf32>
    %394 = arith.mulf %393, %392 : vector<16x2xf32>
    %395 = arith.addf %388, %394 : vector<16x2xf32>
    %396 = vector.extract_strided_slice %192 {offsets = [15, 0], sizes = [1, 2], strides = [1, 1]} : vector<32x2xf32> to vector<1x2xf32>
    %cst_65 = arith.constant 0.000000e+00 : f32
    %397 = vector.broadcast %cst_65 : f32 to vector<15x2xf32>
    %398 = vector.extract_strided_slice %186 {offsets = [0, 0], sizes = [1, 2], strides = [1, 1]} : vector<16x2xf32> to vector<1x2xf32>
    %399 = tpu.concatenate %397, %398 in 0 : vector<15x2xf32>, vector<1x2xf32> -> vector<16x2xf32>
    %400 = vector.broadcast %396 : vector<1x2xf32> to vector<16x2xf32>
    %401 = arith.mulf %400, %399 : vector<16x2xf32>
    %402 = arith.addf %395, %401 : vector<16x2xf32>
    %403 = vector.extract_strided_slice %192 {offsets = [31, 0], sizes = [1, 2], strides = [1, 1]} : vector<32x2xf32> to vector<1x2xf32>
    %cst_66 = arith.constant 0.000000e+00 : f32
    %404 = vector.broadcast %cst_66 : f32 to vector<15x2xf32>
    %405 = vector.extract_strided_slice %191 {offsets = [0, 0], sizes = [1, 2], strides = [1, 1]} : vector<16x2xf32> to vector<1x2xf32>
    %406 = tpu.concatenate %404, %405 in 0 : vector<15x2xf32>, vector<1x2xf32> -> vector<16x2xf32>
    %407 = vector.broadcast %403 : vector<1x2xf32> to vector<16x2xf32>
    %408 = arith.mulf %407, %406 : vector<16x2xf32>
    %409 = arith.addf %402, %408 : vector<16x2xf32>
    %c0_67 = arith.constant 0 : index
    %c0_68 = arith.constant 0 : index
    %410 = vector.load %arg10[%c0_67, %c0_68] : memref<16x2xf32, #tpu.memory_space<vmem>>, vector<16x2xf32>
    tpu.vector_store %arg10[%c0_67, %c0_68], %409 {strides = array<i32>} : memref<16x2xf32, #tpu.memory_space<vmem>>, vector<16x2xf32>,
    return
  }
}

</mosaic_0001>

<bundles_post_ra>
// kernel: nn_custom_forward.1
= control target key start
LH: loop header
LB: loop body
LE: loop exit
PB: predicated region body
PF: predicated region fallthrough
CT: control target
= control target key end

     0   :  { %vm66_vm0 = vcmask 1041408   ;;  %vm49_vm1 = vcmask 1040384   ;;  %vm83_vm2 = vcmask 1042432   ;;  %vm100_vm3 = vcmask 1043456   ;;  %s1405_s0 = inlined_call_operand.vmem [shape: f32[16,2], index: 0, kind: input, shape index: {}]   ;;  %s1406_s4 = inlined_call_operand.vmem [shape: f32[2,64], index: 4, kind: input, shape index: {}]   ;;  %s1407_s3 = inlined_call_operand.vmem [shape: f32[2,64], index: 3, kind: input, shape index: {}]   ;;  %s1408_s1 = inlined_call_operand.vmem [shape: f32[32,2], index: 1, kind: input, shape index: {}]   ;;  %s1409_s6 = inlined_call_operand.vmem [shape: f32[64,2], index: 6, kind: input, shape index: {}]   ;;  %s1410_s7 = inlined_call_operand.vmem [shape: f32[64,2], index: 7, kind: input, shape index: {}]   ;;  %s1411_s5 = inlined_call_operand.vmem [shape: f32[1,64], index: 5, kind: input, shape index: {}]   ;;  %s1412_s8 = inlined_call_operand.vmem [shape: f32[1,2], index: 8, kind: input, shape index: {}]   ;;  %s1413_s9 = inlined_call_operand.vmem [shape: f32[1,2], index: 9, kind: input, shape index: {}]   ;;  %s1414_s2 = inlined_call_operand.vmem [shape: f32[32,2], index: 2, kind: input, shape index: {}]   ;;  %s1415_s10 = inlined_call_operand.vmem [shape: f32[16,2], index: 10, kind: output, shape index: {}]  }
   0x1   :  { %v747_v0 = vld [vmem:[%s1405_s0] sm:$0xff]  ;;  %v760_v4 = vld [vmem:[%s1408_s1 + $0x10] sm:$0xff]  ;;  %vm117_vm4 = vcmask 1044480   ;;  %vm134_vm5 = vcmask 1045504   ;;  %vm151_vm6 = vcmask 1046528   ;;  %v819_v30 = vld [vmem:[%s1408_s1 + $0x18] sm:$0xff] }
   0x2   :  { %v249_v1 = vld [vmem:[%s1406_s4] sm:$0x3]  ;;  %v67_v2 = vrot.slane %v747_v0, 6  ;;  %v44_v5 = vperm.slane %v760_v4, 0  ;;  %v50_v6 = vrot.slane %v747_v0, 7  ;;  %v61_v7 = vperm.slane %v760_v4, 1 }
   0x3   :  { %656 = vmatpush.msk.msra.mxu0 %vm66_vm0, %v249_v1  ;;  %v248_v3 = vld [vmem:[%s1407_s3] sm:$0x3]  ;;  %v78_v8 = vperm.slane %v760_v4, 2  ;;  %v84_v10 = vrot.slane %v747_v0, 5  ;;  %v95_v11 = vperm.slane %v760_v4, 3  ;;  %v101_v15 = vrot.slane %v747_v0, 4 }
   0x4   :  { %659 = vmatpush.msk.msra.mxu1 %vm66_vm0, %v248_v3  ;;  %v770_v9 = vsel %vm66_vm0, 0.0, %v67_v2  ;;  %v45_v12 = vmul.f32 %v44_v5, %v747_v0  ;;  %v780_v13 = vsel %vm49_vm1, 0.0, %v50_v6  ;;  %v112_v18 = vperm.slane %v760_v4, 4  ;;  %v829_v32 = vld [vmem:[%s1408_s1] sm:$0xff]  ;;  %v838_v36 = vld [vmem:[%s1405_s0 + $0x8] sm:$0xff] }
   0x5   :  { %v79_v14 = vmul.f32 %v78_v8, %v770_v9  ;;  %v62_v16 = vmul.f32 %v61_v7, %v780_v13  ;;  %v792_v17 = vsel %vm83_vm2, 0.0, %v84_v10  ;;  %v118_v19 = vrot.slane %v747_v0, 3  ;;  %v878_v59 = vld [vmem:[%s1408_s1 + $0x8] sm:$0xff] }
   0x6   :  { %v799_v20 = vsel %vm100_vm3, 0.0, %v101_v15  ;;  %v135_v21 = vrot.slane %v747_v0, 2  ;;  %v96_v23 = vmul.f32 %v95_v11, %v792_v17  ;;  %v129_v24 = vperm.slane %v760_v4, 5 }
   0x7   :  { %v64_v22 = vadd.f32 %v62_v16, %v45_v12  ;;  %v809_v25 = vsel %vm117_vm4, 0.0, %v118_v19  ;;  %v152_v26 = vrot.slane %v747_v0, 1  ;;  %v113_v28 = vmul.f32 %v112_v18, %v799_v20 }
   0x8   :  { %v146_v29 = vperm.slane %v760_v4, 6  ;;  %v824_v31 = vsel %vm134_vm5, 0.0, %v135_v21  ;;  %v130_v34 = vmul.f32 %v129_v24, %v809_v25  ;;  %v163_v35 = vperm.slane %v760_v4, 7 }
   0x9   :  { %v81_v27 = vadd.f32 %v79_v14, %v64_v22  ;;  %v843_v37 = vsel %vm151_vm6, 0.0, %v152_v26  ;;  %v68_v38 = vrot.slane %v838_v36, 6  ;;  %v173_v41 = vperm.slane %v819_v30, 0 }
   0xa   :  { %v147_v40 = vmul.f32 %v146_v29, %v824_v31  ;;  %v183_v42 = vperm.slane %v819_v30, 1  ;;  %v193_v43 = vperm.slane %v819_v30, 2  ;;  %v41_v44 = vperm.slane %v829_v32, 0 }
   0xb   :  { %v98_v33 = vadd.f32 %v96_v23, %v81_v27  ;;  %v56_v45 = vperm.slane %v829_v32, 1  ;;  %v164_v47 = vmul.f32 %v163_v35, %v843_v37  ;;  %v203_v48 = vperm.slane %v819_v30, 3 }
   0xc   :  { %v73_v49 = vperm.slane %v829_v32, 2  ;;  %v42_v50 = vmul.f32 %v41_v44, %v747_v0  ;;  %v90_v52 = vperm.slane %v829_v32, 3  ;;  %v107_v53 = vperm.slane %v829_v32, 4 }
   0xd   :  { %v115_v39 = vadd.f32 %v113_v28, %v98_v33  ;;  %v57_v51 = vmul.f32 %v56_v45, %v780_v13  ;;  %v174_v55 = vmul.f32 0.0, %v173_v41  ;;  %v1420_v56 = vperm.slane %v819_v30, 4 }
   0xe   :  { %v74_v57 = vmul.f32 %v73_v49, %v770_v9  ;;  %v184_v58 = vmul.f32 0.0, %v183_v42  ;;  %v91_v61 = vmul.f32 %v90_v52, %v792_v17  ;;  %v124_v62 = vperm.slane %v829_v32, 5 }
   0xf   :  { %v132_v46 = vadd.f32 %v130_v34, %v115_v39  ;;  %v59_v60 = vadd.f32 %v57_v51, %v42_v50  ;;  %v1418_v1 = vperm.slane %v819_v30, 5  ;;  %v1417_v3 = vperm.slane %v819_v30, 6 }
  0x10   :  { %v1416_v12 = vperm.slane %v819_v30, 7  ;;  %v108_v16 = vmul.f32 %v107_v53, %v799_v20  ;;  %v141_v22 = vperm.slane %v829_v32, 6  ;;  %v158_v23 = vperm.slane %v829_v32, 7 }
  0x11   :  { %v149_v54 = vadd.f32 %v147_v40, %v132_v46  ;;  %v76_v14 = vadd.f32 %v74_v57, %v59_v60  ;;  %v895_v27 = vsel %vm66_vm0, %v67_v2, %v68_v38  ;;  %v194_v33 = vmul.f32 0.0, %v193_v43 }
  0x12   :  { %v1419_v34 = vperm.slane %v878_v59, 0  ;;  %v204_v39 = vmul.f32 0.0, %v203_v48  ;;  %v214_v40 = vmul.f32 0.0, %v1420_v56  ;;  %v224_v2 = vmul.f32 0.0, %v1418_v1 }
  0x13   :  { %v166_v63 = vadd.f32 %v164_v47, %v149_v54  ;;  %v93_v46 = vadd.f32 %v91_v61, %v76_v14  ;;  %v125_v47 = vmul.f32 %v124_v62, %v809_v25  ;;  %v234_v38 = vmul.f32 0.0, %v1417_v3 }
  0x14   :  { %v244_v51 = vmul.f32 0.0, %v1416_v12  ;;  %v159_v57 = vmul.f32 %v158_v23, %v843_v37  ;;  %v169_v61 = vmul.f32 0.0, %v1419_v34  ;;  %v51_v14 = vrot.slane %v838_v36, 7 }
  0x15   :  { %v176_v28 = vadd.f32 %v174_v55, %v166_v63  ;;  %v110_v54 = vadd.f32 %v108_v16, %v93_v46  ;;  %v142_v55 = vmul.f32 %v141_v22, %v824_v31  ;;  %v188_v63 = vperm.slane %v878_v59, 2 }
  0x16   :  { %vm250_vm7 = vcmask 15360   ;;  %v85_v46 = vrot.slane %v838_v36, 5  ;;  %v102_v12 = vrot.slane %v838_v36, 4  ;;  %v119_v1 = vrot.slane %v838_v36, 3 }
  0x17   :  { %v186_v50 = vadd.f32 %v184_v58, %v176_v28  ;;  %v178_v58 = vperm.slane %v878_v59, 1  ;;  %v127_v16 = vadd.f32 %v125_v47, %v110_v54  ;;  %v46_v28 = vmul.f32 %v44_v5, %v838_v36 }
  0x18   :  { %v86_v5 = vsel %vm83_vm2, %v84_v10, %v85_v46  ;;  %v198_v34 = vperm.slane %v878_v59, 3  ;;  %v153_v46 = vrot.slane %v838_v36, 1  ;;  %v175_v4 = vmul.f32 %v173_v41, %v747_v0 }
  0x19   :  { %v196_v60 = vadd.f32 %v194_v33, %v186_v50  ;;  %v52_v33 = vsel %vm49_vm1, %v50_v6, %v51_v14  ;;  %v80_v50 = vmul.f32 %v78_v8, %v895_v27  ;;  %v144_v47 = vadd.f32 %v142_v55, %v127_v16 }
  0x1a   :  { %v63_v54 = vmul.f32 %v61_v7, %v52_v33  ;;  %v208_v6 = vperm.slane %v878_v59, 4  ;;  %v103_v8 = vsel %vm100_vm3, %v101_v15, %v102_v12  ;;  %v179_v55 = vmul.f32 0.0, %v178_v58 }
  0x1b   :  { %v206_v3 = vadd.f32 %v204_v39, %v196_v60  ;;  %v136_v39 = vrot.slane %v838_v36, 2  ;;  %v161_v14 = vadd.f32 %v159_v57, %v144_v47  ;;  %v97_v16 = vmul.f32 %v95_v11, %v86_v5 }
  0x1c   :  { %v65_v7 = vadd.f32 %v63_v54, %v46_v28  ;;  %v114_v12 = vmul.f32 %v112_v18, %v103_v8  ;;  %v209_v28 = vmul.f32 0.0, %v208_v6  ;;  %v154_v18 = vsel %vm151_vm6, %v152_v26, %v153_v46  ;;  %v330_v26 = vld [vmem:[%s1409_s6 + $0x38] sm:$0xff] }
  0x1d   :  { %v216_v60 = vadd.f32 %v214_v40, %v206_v3  ;;  %v189_v3 = vmul.f32 0.0, %v188_v63  ;;  %v120_v40 = vsel %vm117_vm4, %v118_v19, %v119_v1  ;;  %v171_v56 = vadd.f32 %v169_v61, %v161_v14  ;;  %350 = vmatpush.msrb.mxu0 %v330_v26  ;;  %666 = vmatpush.msra.mxu2 %v330_v26 }
  0x1e   :  { %v82_v15 = vadd.f32 %v80_v50, %v65_v7  ;;  %v137_v57 = vsel %vm134_vm5, %v135_v21, %v136_v39  ;;  %v218_v19 = vperm.slane %v878_v59, 5  ;;  %v131_v61 = vmul.f32 %v129_v24, %v120_v40 }
  0x1f   :  { %v226_v10 = vadd.f32 %v224_v2, %v216_v60  ;;  %v199_v2 = vmul.f32 0.0, %v198_v34  ;;  %v181_v1 = vadd.f32 %v179_v55, %v171_v56  ;;  %v228_v21 = vperm.slane %v878_v59, 6  ;;  %v371_v55 = vld [vmem:[%s1410_s7 + $0x30] sm:$0xff] }
  0x20   :  { %v99_v47 = vadd.f32 %v97_v16, %v82_v15  ;;  %v43_v54 = vmul.f32 %v41_v44, %v838_v36  ;;  %v58_v60 = vmul.f32 %v56_v45, %v52_v33  ;;  %v75_v24 = vmul.f32 %v73_v49, %v895_v27  ;;  %v329_v49 = vld [vmem:[%s1409_s6 + $0x30] sm:$0xff] }
  0x21   :  { %v236_v11 = vadd.f32 %v234_v38, %v226_v10  ;;  %v148_v38 = vmul.f32 %v146_v29, %v137_v57  ;;  %v191_v39 = vadd.f32 %v189_v3, %v181_v1  ;;  %v372_v29 = vld [vmem:[%s1410_s7 + $0x38] sm:$0xff]  ;;  %v219_v36 = vmul.f32 0.0, %v218_v19  ;;  %351 = vmatpush.msrb.mxu0 %v329_v49  ;;  %667 = vmatpush.msra.mxu2 %v329_v49 }
  0x22   :  { %v116_v56 = vadd.f32 %v114_v12, %v99_v47  ;;  %v238_v44 = vperm.slane %v878_v59, 7  ;;  %v165_v45 = vmul.f32 %v163_v35, %v154_v18  ;;  %v60_v33 = vadd.f32 %v58_v60, %v43_v54  ;;  %385 = vmatpush.msrb.mxu1 %v372_v29  ;;  %674 = vmatpush.msra.mxu3 %v372_v29 }
  0x23   :  { %v246_v50 = vadd.f32 %v244_v51, %v236_v11  ;;  %v201_v27 = vadd.f32 %v199_v2, %v191_v39  ;;  %v92_v14 = vmul.f32 %v90_v52, %v86_v5  ;;  %v229_v7 = vmul.f32 0.0, %v228_v21 }
  0x24   :  { %v133_v51 = vadd.f32 %v131_v61, %v116_v56  ;;  %v77_v10 = vadd.f32 %v75_v24, %v60_v33  ;;  %v109_v3 = vmul.f32 %v107_v53, %v103_v8  ;;  %v239_v52 = vmul.f32 0.0, %v238_v44  ;;  %386 = vmatpush.msrb.mxu1 %v371_v55  ;;  %675 = vmatpush.msra.mxu3 %v371_v55  ;;  %v324_v55 = vld [vmem:[%s1409_s6 + $0x8] sm:$0xff] }
  0x25   :  { %657 = vmatmul.msk.f32.vlgmr.msra.gmra.mxu0 %vm250_vm7, %v246_v50  ;;  %v211_v35 = vadd.f32 %v209_v28, %v201_v27  ;;  %v185_v5 = vmul.f32 %v183_v42, %v780_v13  ;;  %v126_v12 = vmul.f32 %v124_v62, %v120_v40  ;;  %v195_v53 = vmul.f32 %v193_v43, %v770_v9 }
  0x26   :  { %v150_v16 = vadd.f32 %v148_v38, %v133_v51  ;;  %v94_v41 = vadd.f32 %v92_v14, %v77_v10  ;;  %v143_v42 = vmul.f32 %v141_v22, %v137_v57  ;;  %v205_v28 = vmul.f32 %v203_v48, %v792_v17  ;;  %v682_v10 = vld [vmem:[%s1411_s5] ss:$0 sm:$0xff] }
  0x27   :  { %v221_v46 = vadd.f32 %v219_v36, %v211_v35  ;;  %v160_v40 = vmul.f32 %v158_v23, %v154_v18  ;;  %v1421_v61 = vperm.slane %v819_v30, 4  ;;  %v1422_v22 = vperm.slane %v878_v59, 0  ;;  %v326_v59 = vld [vmem:[%s1409_s6 + $0x18] sm:$0xff]  ;;  %v365_v35 = vld [vmem:[%s1410_s7] sm:$0xff] }
  0x28   :  { %v167_v15 = vadd.f32 %v165_v45, %v150_v16  ;;  %v111_v2 = vadd.f32 %v109_v3, %v94_v41  ;;  %v1423_v48 = vperm.slane %v819_v30, 5  ;;  %v180_v32 = vmul.f32 %v178_v58, %v780_v13 }
  0x29   :  { %v231_v8 = vadd.f32 %v229_v7, %v221_v46  ;;  %v215_v50 = vmul.f32 %v1421_v61, %v799_v20  ;;  %v170_v57 = vmul.f32 %v1422_v22, %v747_v0  ;;  %v1424_v18 = vperm.slane %v819_v30, 6  ;;  %v366_v7 = vld [vmem:[%s1410_s7 + $0x8] sm:$0xff] }
  0x2a   :  { %v177_v11 = vadd.f32 %v175_v4, %v167_v15  ;;  %v128_v62 = vadd.f32 %v126_v12, %v111_v2  ;;  %v225_v39 = vmul.f32 %v1423_v48, %v809_v25  ;;  %v190_v0 = vmul.f32 %v188_v63, %v770_v9  ;;  %v323_v4 = vld [vmem:[%s1409_s6] sm:$0xff] }
  0x2b   :  { %v241_v1 = vadd.f32 %v239_v52, %v231_v8  ;;  %v235_v60 = vmul.f32 %v1424_v18, %v824_v31  ;;  %v1425_v29 = vperm.slane %v819_v30, 7  ;;  %v200_v13 = vmul.f32 %v198_v34, %v792_v17 }
  0x2c   :  { %v187_v47 = vadd.f32 %v185_v5, %v177_v11  ;;  %v145_v38 = vadd.f32 %v143_v42, %v128_v62  ;;  %v210_v27 = vmul.f32 %v208_v6, %v799_v20  ;;  %v220_v9 = vmul.f32 %v218_v19, %v809_v25  ;;  %v328_v25 = vld [vmem:[%s1409_s6 + $0x28] sm:$0xff]  ;;  %v368_v19 = vld [vmem:[%s1410_s7 + $0x18] sm:$0xff]  ;;  %v683_v11 = vld [vmem:[%s1412_s8] ss:$0 sm:$0xff] }
  0x2d   :  { %660 = vmatmul.msk.f32.vlgmr.msra.gmra.mxu1 %vm250_vm7, %v241_v1  ;;  %v245_v36 = vmul.f32 %v1425_v29, %v843_v37  ;;  %v230_v63 = vmul.f32 %v228_v21, %v824_v31  ;;  %v240_v34 = vmul.f32 %v238_v44, %v843_v37  ;;  %v370_v6 = vld [vmem:[%s1410_s7 + $0x28] sm:$0xff]  ;;  %v327_v31 = vld [vmem:[%s1409_s6 + $0x20] sm:$0xff]  ;;  %352 = vmatpush.msrb.mxu0 %v328_v25  ;;  %v325_v21 = vld [vmem:[%s1409_s6 + $0x10] sm:$0xff]  ;;  %vm335_vm8 = vcmask 523264  }
  0x2e   :  { %v197_v43 = vadd.f32 %v195_v53, %v187_v47  ;;  %v162_v56 = vadd.f32 %v160_v40, %v145_v38  ;;  %387 = vmatpush.msrb.mxu1 %v370_v6  ;;  %v369_v37 = vld [vmem:[%s1410_s7 + $0x20] sm:$0xff]  ;;  %668 = vmatpush.msra.mxu2 %v328_v25  ;;  %v367_v44 = vld [vmem:[%s1410_s7 + $0x10] sm:$0xff] }
  0x2f   :  { %676 = vmatpush.msra.mxu3 %v370_v6  ;;  %353 = vmatpush.msrb.mxu0 %v327_v31  ;;  %v1116_v47 = vld [vmem:[%s1414_s2] sm:$0xff] }
  0x30   :  { %v207_v54 = vadd.f32 %v205_v28, %v197_v43  ;;  %v172_v24 = vadd.f32 %v170_v57, %v162_v56  ;;  %388 = vmatpush.msrb.mxu1 %v369_v37  ;;  %669 = vmatpush.msra.mxu2 %v327_v31  ;;  %v684_v28 = vld [vmem:[%s1413_s9] ss:$0 sm:$0xff]  ;;  %v1124_v43 = vld [vmem:[%s1414_s2 + $0x10] sm:$0xff]  ;;  %v404_v61 = vperm.slane %v1116_v47, 0 }
  0x31   :  { %677 = vmatpush.msra.mxu3 %v369_v37  ;;  %354 = vmatpush.msrb.mxu0 %v326_v59  ;;  %v407_v38 = vperm.slane %v1124_v43, 0 }
  0x32   :  { %v217_v23 = vadd.f32 %v215_v50, %v207_v54  ;;  %v182_v45 = vadd.f32 %v180_v32, %v172_v24  ;;  %389 = vmatpush.msrb.mxu1 %v368_v19  ;;  %670 = vmatpush.msra.mxu2 %v326_v59  ;;  %v420_v50 = vperm.slane %v1116_v47, 1  ;;  %v433_v32 = vperm.slane %v1124_v43, 1 }
  0x33   :  { %678 = vmatpush.msra.mxu3 %v368_v19  ;;  %355 = vmatpush.msrb.mxu0 %v325_v21 }
  0x34   :  { %v227_v26 = vadd.f32 %v225_v39, %v217_v23  ;;  %v192_v49 = vadd.f32 %v190_v0, %v182_v45  ;;  %390 = vmatpush.msrb.mxu1 %v367_v44  ;;  %671 = vmatpush.msra.mxu2 %v325_v21 }
  0x35   :  { %679 = vmatpush.msra.mxu3 %v367_v44  ;;  %356 = vmatpush.msrb.mxu0 %v324_v55 }
  0x36   :  { %v237_v58 = vadd.f32 %v235_v60, %v227_v26  ;;  %v202_v33 = vadd.f32 %v200_v13, %v192_v49  ;;  %391 = vmatpush.msrb.mxu1 %v366_v7  ;;  %672 = vmatpush.msra.mxu2 %v324_v55  ;;  %v444_v60 = vperm.slane %v1116_v47, 2  ;;  %v488_v55 = vperm.slane %v1116_v47, 4 }
  0x37   :  { %680 = vmatpush.msra.mxu3 %v366_v7  ;;  %357 = vmatpush.msrb.mxu0 %v323_v4 }
  0x38   :  { %v247_v51 = vadd.f32 %v245_v36, %v237_v58  ;;  %v212_v30 = vadd.f32 %v210_v27, %v202_v33  ;;  %392 = vmatpush.msrb.mxu1 %v365_v35  ;;  %673 = vmatpush.msra.mxu2 %v323_v4  ;;  %v455_v36 = vperm.slane %v1124_v43, 2  ;;  %v466_v27 = vperm.slane %v1116_v47, 3 }
  0x39   :  { %681 = vmatpush.msra.mxu3 %v365_v35 }
  0x3a   :  { %658 = vmatmul.msk.f32.gmra.mxu0 %vm250_vm7, %v247_v51  ;;  %v222_v17 = vadd.f32 %v220_v9, %v212_v30 }
  0x3c   :  { %v232_v14 = vadd.f32 %v230_v63, %v222_v17 }
  0x3e   :  { %v242_v20 = vadd.f32 %v240_v34, %v232_v14  ;;  %v477_v34 = vperm.slane %v1124_v43, 3 }
  0x40   :  { %661 = vmatmul.msk.f32.gmra.mxu1 %vm250_vm7, %v242_v20 }
  0xa2   :  { %v277_v16 = vpop.f32.mrf.mxu0 }
  0xaa   :  { %v309_v3 = vpop.f32.mrf.mxu1 }
  0xab   :  { %v310_v52 = vadd.f32 %v309_v3, %v277_v16 }
  0xad   :  { %v319_v5 = vadd.f32 %v682_v10, %v310_v52  ;;  %v499_v52 = vperm.slane %v1124_v43, 4 }
  0xaf   :  { %685 = vtanh.f32 %v319_v5 }
  0xb5   :  { %v686_v46 = vpop.eup %685 }
  0xb6   :  { %662 = vmatmul.msk.f32.vlgmr.msrb.gmra.mxu0 %vm335_vm8, %v686_v46  ;;  %664 = vmatmul.msk.f32.vlgmr.msrb.gmra.mxu1 %vm335_vm8, %v686_v46 }
  0xb7   :  { %v280_v15 = vpop.f32.mrf.mxu0 }
  0xbd   :  { %v312_v41 = vpop.f32.mrf.mxu1 }
  0xbe   :  { %v313_v12 = vadd.f32 %v312_v41, %v280_v15  ;;  %v510_v15 = vperm.slane %v1116_v47, 5 }
  0xc0   :  { %v320_v53 = vadd.f32 %v682_v10, %v313_v12 }
  0xc2   :  { %687 = vtanh.f32 %v320_v53 }
  0xc8   :  { %v688_v8 = vpop.eup %687 }
  0xc9   :  { %663 = vmatmul.msk.f32.vlgmr.msra.gmra.mxu2 %vm335_vm8, %v688_v8  ;;  %665 = vmatmul.msk.f32.vlgmr.msra.gmra.mxu3 %vm335_vm8, %v688_v8 }
 0x133   :  { %v359_v2 = vpop.f32.mrf.mxu0  ;;  %v394_v1 = vpop.f32.mrf.mxu1 }
 0x134   :  { %v1108_v42 = vadd.f32 %v683_v11, %v359_v2  ;;  %v1119_v40 = vadd.f32 %v684_v28, %v394_v1 }
 0x136   :  { %v414_v62 = vrot.slane %v1108_v42, 7  ;;  %v427_v22 = vrot.slane %v1119_v40, 7  ;;  %v405_v54 = vmul.f32 %v404_v61, %v1108_v42  ;;  %v438_v48 = vrot.slane %v1108_v42, 6 }
 0x137   :  { %v408_v56 = vmul.f32 %v407_v38, %v1119_v40  ;;  %v449_v23 = vrot.slane %v1119_v40, 6  ;;  %v460_v45 = vrot.slane %v1108_v42, 5  ;;  %v471_v9 = vrot.slane %v1119_v40, 5 }
 0x138   :  { %v1131_v57 = vsel %vm49_vm1, 0.0, %v414_v62  ;;  %v1142_v18 = vsel %vm49_vm1, 0.0, %v427_v22  ;;  %v1148_v0 = vsel %vm66_vm0, 0.0, %v438_v48  ;;  %v482_v14 = vrot.slane %v1108_v42, 4 }
 0x139   :  { %v421_v39 = vmul.f32 %v420_v50, %v1131_v57  ;;  %v410_v24 = vadd.f32 %v408_v56, %v405_v54  ;;  %v434_v29 = vmul.f32 %v433_v32, %v1142_v18  ;;  %v1158_v13 = vsel %vm66_vm0, 0.0, %v449_v23 }
 0x13a   :  { %v445_v58 = vmul.f32 %v444_v60, %v1148_v0  ;;  %v456_v33 = vmul.f32 %v455_v36, %v1158_v13  ;;  %v1171_v30 = vsel %vm83_vm2, 0.0, %v460_v45  ;;  %v1181_v6 = vsel %vm83_vm2, 0.0, %v471_v9 }
 0x13b   :  { %v423_v26 = vadd.f32 %v421_v39, %v410_v24  ;;  %v467_v17 = vmul.f32 %v466_v27, %v1171_v30  ;;  %v493_v19 = vrot.slane %v1119_v40, 4  ;;  %v504_v21 = vrot.slane %v1108_v42, 3 }
 0x13c   :  { %v478_v7 = vmul.f32 %v477_v34, %v1181_v6  ;;  %v1198_v35 = vsel %vm100_vm3, 0.0, %v482_v14  ;;  %v515_v5 = vrot.slane %v1119_v40, 3  ;;  %v526_v2 = vrot.slane %v1108_v42, 2 }
 0x13d   :  { %v436_v49 = vadd.f32 %v434_v29, %v423_v26  ;;  %v1208_v41 = vsel %vm100_vm3, 0.0, %v493_v19  ;;  %v489_v53 = vmul.f32 %v488_v55, %v1198_v35  ;;  %v1217_v8 = vsel %vm117_vm4, 0.0, %v504_v21 }
 0x13e   :  { %v500_v54 = vmul.f32 %v499_v52, %v1208_v41  ;;  %v537_v39 = vrot.slane %v1119_v40, 2  ;;  %v511_v56 = vmul.f32 %v510_v15, %v1217_v8  ;;  %v1235_v26 = vsel %vm117_vm4, 0.0, %v515_v5 }
 0x13f   :  { %v447_v51 = vadd.f32 %v445_v58, %v436_v49 }
 0x141   :  { %v458_v63 = vadd.f32 %v456_v33, %v447_v51  ;;  %v548_v33 = vrot.slane %v1108_v42, 1 }
 0x143   :  { %v469_v59 = vadd.f32 %v467_v17, %v458_v63  ;;  %v1248_v63 = vsel %vm134_vm5, 0.0, %v526_v2 }
 0x145   :  { %v480_v3 = vadd.f32 %v478_v7, %v469_v59 }
 0x14c   :  { %v362_v20 = vpop.f32.mrf.mxu2  ;;  %v397_v25 = vpop.f32.mrf.mxu3 }
 0x14d   :  { %v1183_v31 = vadd.f32 %v683_v11, %v362_v20  ;;  %v1185_v37 = vadd.f32 %v684_v28, %v397_v25  ;;  %v532_v11 = vperm.slane %v1116_v47, 6  ;;  %v554_v28 = vperm.slane %v1116_v47, 7 }
 0x14e   :  { %v543_v20 = vperm.slane %v1124_v43, 6 }
 0x14f   :  { %v415_v44 = vrot.slane %v1183_v31, 7  ;;  %v406_v4 = vmul.f32 %v404_v61, %v1183_v31  ;;  %v409_v10 = vmul.f32 %v407_v38, %v1185_v37  ;;  %v439_v12 = vrot.slane %v1183_v31, 6 }
 0x150   :  { %v428_v61 = vrot.slane %v1185_v37, 7  ;;  %v491_v38 = vadd.f32 %v489_v53, %v480_v3  ;;  %v461_v58 = vrot.slane %v1183_v31, 5  ;;  %v472_v25 = vrot.slane %v1185_v37, 5 }
 0x151   :  { %v416_v16 = vsel %vm49_vm1, %v414_v62, %v415_v44  ;;  %v411_v1 = vadd.f32 %v409_v10, %v406_v4  ;;  %v521_v62 = vperm.slane %v1124_v43, 5  ;;  %v440_v29 = vsel %vm66_vm0, %v438_v48, %v439_v12 }
 0x152   :  { %v422_v46 = vmul.f32 %v420_v50, %v416_v16  ;;  %v450_v50 = vrot.slane %v1185_v37, 6  ;;  %v429_v49 = vsel %vm49_vm1, %v427_v22, %v428_v61  ;;  %v502_v51 = vadd.f32 %v500_v54, %v491_v38 }
 0x153   :  { %v435_v17 = vmul.f32 %v433_v32, %v429_v49  ;;  %v522_v59 = vmul.f32 %v521_v62, %v1235_v26  ;;  %v559_v44 = vrot.slane %v1119_v40, 1  ;;  %v446_v7 = vmul.f32 %v444_v60, %v440_v29 }
 0x154   :  { %v424_v24 = vadd.f32 %v422_v46, %v411_v1  ;;  %v451_v48 = vsel %vm66_vm0, %v449_v23, %v450_v50  ;;  %v513_v22 = vadd.f32 %v511_v56, %v502_v51  ;;  %v1266_v32 = vsel %vm134_vm5, 0.0, %v537_v39  ;;  %v1271_v23 = vld [vmem:[%s1414_s2 + $0x8] sm:$0xff] }
 0x155   :  { %v462_v16 = vsel %vm83_vm2, %v460_v45, %v461_v58  ;;  %v483_v10 = vrot.slane %v1183_v31, 4  ;;  %v533_v60 = vmul.f32 %v532_v11, %v1248_v63  ;;  %v1283_v46 = vsel %vm151_vm6, 0.0, %v548_v33  ;;  %v1291_v45 = vld [vmem:[%s1414_s2 + $0x18] sm:$0xff] }
 0x156   :  { %v437_v4 = vadd.f32 %v435_v17, %v424_v24  ;;  %v524_v3 = vadd.f32 %v522_v59, %v513_v22  ;;  %v457_v53 = vmul.f32 %v455_v36, %v451_v48  ;;  %v565_v1 = vperm.slane %v1124_v43, 7 }
 0x157   :  { %v473_v61 = vsel %vm83_vm2, %v471_v9, %v472_v25  ;;  %v494_v50 = vrot.slane %v1185_v37, 4  ;;  %v544_v54 = vmul.f32 %v543_v20, %v1266_v32  ;;  %v570_v36 = vperm.slane %v1271_v23, 0 }
 0x158   :  { %v448_v12 = vadd.f32 %v446_v7, %v437_v4  ;;  %v535_v38 = vadd.f32 %v533_v60, %v524_v3  ;;  %v468_v56 = vmul.f32 %v466_v27, %v462_v16  ;;  %v1306_v29 = vsel %vm151_vm6, 0.0, %v559_v44 }
 0x159   :  { %v484_v9 = vsel %vm100_vm3, %v482_v14, %v483_v10  ;;  %v505_v58 = vrot.slane %v1183_v31, 3  ;;  %v555_v49 = vmul.f32 %v554_v28, %v1283_v46  ;;  %v571_v27 = vmul.f32 0.0, %v570_v36 }
 0x15a   :  { %v459_v24 = vadd.f32 %v457_v53, %v448_v12  ;;  %v546_v51 = vadd.f32 %v544_v54, %v535_v38  ;;  %v575_v17 = vperm.slane %v1291_v45, 0  ;;  %v479_v25 = vmul.f32 %v477_v34, %v473_v61 }
 0x15b   :  { %v495_v14 = vsel %vm100_vm3, %v493_v19, %v494_v50  ;;  %v516_v22 = vrot.slane %v1185_v37, 3  ;;  %v566_v7 = vmul.f32 %v565_v1, %v1306_v29  ;;  %v490_v16 = vmul.f32 %v488_v55, %v484_v9 }
 0x15c   :  { %v470_v48 = vadd.f32 %v468_v56, %v459_v24  ;;  %v557_v59 = vadd.f32 %v555_v49, %v546_v51  ;;  %v576_v4 = vmul.f32 0.0, %v575_v17  ;;  %v506_v34 = vsel %vm117_vm4, %v504_v21, %v505_v58 }
 0x15d   :  { %v527_v60 = vrot.slane %v1183_v31, 2  ;;  %v580_v19 = vperm.slane %v1271_v23, 1  ;;  %v501_v53 = vmul.f32 %v499_v52, %v495_v14  ;;  %v585_v61 = vperm.slane %v1291_v45, 1 }
 0x15e   :  { %v481_v10 = vadd.f32 %v479_v25, %v470_v48  ;;  %v568_v3 = vadd.f32 %v566_v7, %v557_v59  ;;  %v517_v55 = vsel %vm117_vm4, %v515_v5, %v516_v22  ;;  %v538_v38 = vrot.slane %v1185_v37, 2 }
 0x15f   :  { %v581_v50 = vmul.f32 0.0, %v580_v19  ;;  %v512_v21 = vmul.f32 %v510_v15, %v506_v34  ;;  %v590_v56 = vperm.slane %v1271_v23, 2  ;;  %v528_v52 = vsel %vm134_vm5, %v526_v2, %v527_v60 }
 0x160   :  { %v492_v12 = vadd.f32 %v490_v16, %v481_v10  ;;  %v573_v54 = vadd.f32 %v571_v27, %v568_v3  ;;  %v549_v9 = vrot.slane %v1183_v31, 1  ;;  %v586_v49 = vmul.f32 0.0, %v585_v61 }
 0x161   :  { %v523_v5 = vmul.f32 %v521_v62, %v517_v55  ;;  %v595_v27 = vperm.slane %v1291_v45, 2  ;;  %v591_v48 = vmul.f32 0.0, %v590_v56  ;;  %v539_v15 = vsel %vm134_vm5, %v537_v39, %v538_v38 }
 0x162   :  { %v503_v24 = vadd.f32 %v501_v53, %v492_v12  ;;  %v578_v58 = vadd.f32 %v576_v4, %v573_v54  ;;  %v560_v25 = vrot.slane %v1185_v37, 1  ;;  %v534_v2 = vmul.f32 %v532_v11, %v528_v52 }
 0x163   :  { %v550_v22 = vsel %vm151_vm6, %v548_v33, %v549_v9  ;;  %v600_v62 = vperm.slane %v1271_v23, 3  ;;  %v596_v7 = vmul.f32 0.0, %v595_v27  ;;  %v545_v16 = vmul.f32 %v543_v20, %v539_v15 }
 0x164   :  { %v514_v51 = vadd.f32 %v512_v21, %v503_v24  ;;  %v583_v14 = vadd.f32 %v581_v50, %v578_v58  ;;  %v561_v37 = vsel %vm151_vm6, %v559_v44, %v560_v25  ;;  %v605_v11 = vperm.slane %v1291_v45, 3 }
 0x165   :  { %v601_v39 = vmul.f32 0.0, %v600_v62  ;;  %v556_v34 = vmul.f32 %v554_v28, %v550_v22  ;;  %v610_v60 = vperm.slane %v1271_v23, 4  ;;  %v567_v20 = vmul.f32 %v565_v1, %v561_v37 }
 0x166   :  { %v525_v31 = vadd.f32 %v523_v5, %v514_v51  ;;  %v588_v59 = vadd.f32 %v586_v49, %v583_v14  ;;  %v606_v12 = vmul.f32 0.0, %v605_v11  ;;  %v615_v38 = vperm.slane %v1291_v45, 4 }
 0x167   :  { %v611_v50 = vmul.f32 0.0, %v610_v60  ;;  %v572_v44 = vmul.f32 %v570_v36, %v1108_v42  ;;  %v620_v47 = vperm.slane %v1271_v23, 5  ;;  %v577_v24 = vmul.f32 %v575_v17, %v1119_v40 }
 0x168   :  { %v536_v4 = vadd.f32 %v534_v2, %v525_v31  ;;  %v593_v10 = vadd.f32 %v591_v48, %v588_v59  ;;  %v616_v21 = vmul.f32 0.0, %v615_v38  ;;  %v625_v43 = vperm.slane %v1291_v45, 5 }
 0x169   :  { %v621_v9 = vmul.f32 0.0, %v620_v47  ;;  %v582_v1 = vmul.f32 %v580_v19, %v1131_v57  ;;  %v630_v51 = vperm.slane %v1271_v23, 6  ;;  %v587_v36 = vmul.f32 %v585_v61, %v1142_v18 }
 0x16a   :  { %v547_v33 = vadd.f32 %v545_v16, %v536_v4  ;;  %v598_v3 = vadd.f32 %v596_v7, %v593_v10  ;;  %v626_v48 = vmul.f32 0.0, %v625_v43  ;;  %v635_v14 = vperm.slane %v1291_v45, 6 }
 0x16b   :  { %v631_v15 = vmul.f32 0.0, %v630_v51  ;;  %v592_v40 = vmul.f32 %v590_v56, %v1148_v0  ;;  %v640_v2 = vperm.slane %v1271_v23, 7  ;;  %v597_v19 = vmul.f32 %v595_v27, %v1158_v13 }
 0x16c   :  { %v558_v53 = vadd.f32 %v556_v34, %v547_v33  ;;  %v603_v55 = vadd.f32 %v601_v39, %v598_v3  ;;  %v636_v22 = vmul.f32 0.0, %v635_v14  ;;  %v645_v4 = vperm.slane %v1291_v45, 7 }
 0x16d   :  { %v641_v59 = vmul.f32 0.0, %v640_v2  ;;  %v602_v18 = vmul.f32 %v600_v62, %v1171_v30  ;;  %v607_v0 = vmul.f32 %v605_v11, %v1181_v6  ;;  %v612_v23 = vmul.f32 %v610_v60, %v1198_v35 }
 0x16e   :  { %v569_v54 = vadd.f32 %v567_v20, %v558_v53  ;;  %v608_v28 = vadd.f32 %v606_v12, %v603_v55  ;;  %v646_v39 = vmul.f32 0.0, %v645_v4  ;;  %v617_v13 = vmul.f32 %v615_v38, %v1208_v41 }
 0x16f   :  { %v622_v30 = vmul.f32 %v620_v47, %v1217_v8  ;;  %v627_v62 = vmul.f32 %v625_v43, %v1235_v26  ;;  %v632_v6 = vmul.f32 %v630_v51, %v1248_v63  ;;  %v637_v60 = vmul.f32 %v635_v14, %v1266_v32 }
 0x170   :  { %v574_v52 = vadd.f32 %v572_v44, %v569_v54  ;;  %v613_v58 = vadd.f32 %v611_v50, %v608_v28  ;;  %v642_v3 = vmul.f32 %v640_v2, %v1283_v46  ;;  %v647_v53 = vmul.f32 %v645_v4, %v1306_v29 }
 0x172   :  { %v579_v49 = vadd.f32 %v577_v24, %v574_v52  ;;  %v618_v5 = vadd.f32 %v616_v21, %v613_v58 }
 0x174   :  { %v584_v42 = vadd.f32 %v582_v1, %v579_v49  ;;  %v623_v25 = vadd.f32 %v621_v9, %v618_v5 }
 0x176   :  { %v589_v17 = vadd.f32 %v587_v36, %v584_v42  ;;  %v628_v31 = vadd.f32 %v626_v48, %v623_v25 }
 0x178   :  { %v594_v57 = vadd.f32 %v592_v40, %v589_v17  ;;  %v633_v7 = vadd.f32 %v631_v15, %v628_v31 }
 0x17a   :  { %v599_v61 = vadd.f32 %v597_v19, %v594_v57  ;;  %v638_v16 = vadd.f32 %v636_v22, %v633_v7 }
 0x17c   :  { %v604_v37 = vadd.f32 %v602_v18, %v599_v61  ;;  %v643_v56 = vadd.f32 %v641_v59, %v638_v16 }
 0x17e   :  { %v609_v10 = vadd.f32 %v607_v0, %v604_v37  ;;  %v648_v34 = vadd.f32 %v646_v39, %v643_v56 }
 0x180   :  { %v614_v33 = vadd.f32 %v612_v23, %v609_v10  ;;  %650 = vst.msk [vmem:[%s1415_s10] sm:$0xff] %vm250_vm7, %v648_v34 }
 0x182   :  { %v619_v45 = vadd.f32 %v617_v13, %v614_v33 }
 0x184   :  { %v624_v27 = vadd.f32 %v622_v30, %v619_v45 }
 0x186   :  { %v629_v11 = vadd.f32 %v627_v62, %v624_v27 }
 0x188   :  { %v634_v35 = vadd.f32 %v632_v6, %v629_v11 }
 0x18a   :  { %v639_v41 = vadd.f32 %v637_v60, %v634_v35 }
 0x18c   :  { %v644_v12 = vadd.f32 %v642_v3, %v639_v41 }
 0x18e   :  { %v649_v20 = vadd.f32 %v647_v53, %v644_v12 }
 0x190   :  { %651 = vst.msk [vmem:[%s1415_s10 + $0x8] sm:$0xff] %vm250_vm7, %v649_v20 }

</bundles_post_ra>
